<compile_context>
chip_gen: v7x
topology: tpu7x:2x2x1
jax: 0.10.0
libtpu: 0.0.40
codegen_flags: <defaults>
</compile_context>

<pallas_src>
import jax
import jax.numpy as jnp
from jax.experimental import pallas as pl
from jax.experimental.pallas import tpu as pltpu


def _make_kernel(n_heads, head_dim, b_tile, seq_len, hid_dim, attn_dtype):
    # Plain Python scalars only: jnp scalars created here would be captured as
    # constants by the tracer and rejected by pallas_call.
    NEG_INF = -1e10
    inv_scale = 1.0 / (float(head_dim) ** 0.5)

    def kernel(q_in_ref, k_in_ref, v_in_ref, mask_ref,
               wq_ref, bq_ref, wk_ref, bk_ref, wv_ref, bv_ref,
               wo_ref, bo_ref,
               out_ref, attn_ref):
        bt, L, H, nh, hd = b_tile, seq_len, hid_dim, n_heads, head_dim
        rows = bt * L

        # ---- Q/K/V projections over the whole batch tile (bf16 x bf16, f32 acc) ----
        xq = q_in_ref[...].reshape(rows, H)
        xk = k_in_ref[...].reshape(rows, H)
        xv = v_in_ref[...].reshape(rows, H)

        q = jnp.dot(xq, wq_ref[...], preferred_element_type=jnp.float32) + bq_ref[...]
        k = jnp.dot(xk, wk_ref[...], preferred_element_type=jnp.float32) + bk_ref[...]
        v = jnp.dot(xv, wv_ref[...], preferred_element_type=jnp.float32) + bv_ref[...]

        # Head-major layout once; reused by both attention contractions.
        # (rows, H) -> (bt*nh, L, hd): heads folded into the batch dim so the
        # attention matmuls are plain single-batch-dim einsums (MXU-native).
        def to_heads(x):
            x = x.reshape(bt, L, nh, hd).swapaxes(1, 2)       # (bt, nh, L, hd)
            return x.reshape(bt * nh, L, hd).astype(jnp.bfloat16)

        q_h = to_heads(q)
        k_h = to_heads(k)
        v_h = to_heads(v)

        # Mask -> additive bias, built once per tile (mask is exact {0,1} f32).
        neg_bias = jnp.where(mask_ref[...] == 0.0, NEG_INF, 0.0)   # (bt, 1, 1, L)

        # ---- scaled dot-product attention, all (batch, head) pairs at once ----
        e = jnp.einsum("bqd,bkd->bqk", q_h, k_h,
                       preferred_element_type=jnp.float32) * inv_scale  # (bt*nh, L, L)
        e = e.reshape(bt, nh, L, L) + neg_bias                           # broadcast bias
        e = e - jnp.max(e, axis=-1, keepdims=True)
        p = jnp.exp(e)
        # Exact reciprocal so the returned attention rows sum to 1.
        p = p * pl.reciprocal(jnp.sum(p, axis=-1, keepdims=True), approx=False)

        attn_ref[...] = p.astype(attn_dtype)                             # (bt, nh, L, L)

        ctx = jnp.einsum("bqk,bkd->bqd",
                         p.reshape(bt * nh, L, L).astype(jnp.bfloat16), v_h,
                         preferred_element_type=jnp.float32)             # (bt*nh, L, hd)
        ctx = ctx.reshape(bt, nh, L, hd).swapaxes(1, 2).reshape(rows, H)

        # ---- output projection ----
        out = jnp.dot(ctx.astype(jnp.bfloat16), wo_ref[...],
                      preferred_element_type=jnp.float32) + bo_ref[...]
        out_ref[...] = out.reshape(bt, L, H)

    return kernel


def _vmem_limit_bytes():
    """~80% of physical VMEM (v5e/v6e: 128 MiB, v7x: 64 MiB), capped at 100 MiB.
    The scoped default (16/32 MiB) throttles tile size."""
    cap = 64 << 20  # conservative fallback = v7x per-core VMEM
    try:
        cap = int(pltpu.get_tpu_info().vmem_capacity_bytes)
    except Exception:
        pass
    return min(int(cap * 0.8), 100 << 20)


def _vmem_bytes_per_step(bt, L, H, nh, attn_bytes):
    """Rough per-grid-step footprint: double-buffered pipeline blocks + temps."""
    rows = bt * L
    in_blocks = 3 * rows * H * 2 + bt * L * 4                   # q,k,v bf16 + mask f32
    out_blocks = rows * H * 4 + bt * nh * L * L * attn_bytes    # x f32 + attention
    weights = 4 * H * H * 2 + 4 * H * 4                         # bf16 W + f32 b
    pipelined = 2 * (in_blocks + out_blocks + weights)          # double-buffered
    temps = (3 * rows * H * 4            # f32 projection results
             + 3 * rows * H * 2          # bf16 head-major copies
             + 2 * bt * nh * L * L * 4   # energy + probs (f32)
             + rows * H * 4)             # f32 context
    return pipelined + temps


def _choose_b_tile(B, L, H, nh, attn_bytes, budget_bytes):
    """Largest divisor of B whose per-step VMEM estimate fits the budget,
    preferring grids that are >= 2 and even (v7x has 2 TensorCores)."""
    divisors = [t for t in range(1, B + 1) if B % t == 0]
    fit = [t for t in divisors
           if _vmem_bytes_per_step(t, L, H, nh, attn_bytes) <= budget_bytes]
    if not fit:
        fit = [1]
    if B >= 2:
        multi = [t for t in fit if B // t >= 2]
        if multi:
            fit = multi
    even = [t for t in fit if (B // t) % 2 == 0]
    pool = even if even else fit
    return max(pool)


def mha_pallas(query, key, value, mask, params, n_heads, attn_dtype=jnp.bfloat16):
    B, L, H = query.shape
    assert H % n_heads == 0
    head_dim = H // n_heads

    # Canonicalize the mask to exact {0,1} f32 ([B,1,1,L], broadcast over heads
    # and query positions) so the in-kernel `== 0` compare is robust.
    if mask is None:
        mask = jnp.ones((B, 1, 1, L), jnp.float32)
    else:
        mask = (mask != 0).astype(jnp.float32).reshape(B, 1, 1, L)

    vmem_limit = _vmem_limit_bytes()
    attn_bytes = jnp.dtype(attn_dtype).itemsize
    b_tile = _choose_b_tile(B, L, H, n_heads, attn_bytes,
                            budget_bytes=int(vmem_limit * 0.7))
    grid = (B // b_tile,)

    kernel = _make_kernel(n_heads, head_dim, b_tile, L, H, attn_dtype)

    # bf16 operands (MXU-native), f32 accumulation inside the kernel.
    qb = query.astype(jnp.bfloat16)
    kb = key.astype(jnp.bfloat16)
    vb = value.astype(jnp.bfloat16)
    wq = params["wq"].astype(jnp.bfloat16)
    wk = params["wk"].astype(jnp.bfloat16)
    wv = params["wv"].astype(jnp.bfloat16)
    wo = params["wo"].astype(jnp.bfloat16)

    # Constant index_map: the pipeline DMAs each weight exactly once.
    w_spec = pl.BlockSpec((H, H), lambda b: (0, 0))
    b_spec = pl.BlockSpec((1, H), lambda b: (0, 0))

    grid_spec = pltpu.PrefetchScalarGridSpec(
        num_scalar_prefetch=0,
        grid=grid,
        in_specs=[
            pl.BlockSpec((b_tile, L, H), lambda b: (b, 0, 0)),        # query
            pl.BlockSpec((b_tile, L, H), lambda b: (b, 0, 0)),        # key
            pl.BlockSpec((b_tile, L, H), lambda b: (b, 0, 0)),        # value
            pl.BlockSpec((b_tile, 1, 1, L), lambda b: (b, 0, 0, 0)),  # mask
            w_spec, b_spec,   # wq, bq
            w_spec, b_spec,   # wk, bk
            w_spec, b_spec,   # wv, bv
            w_spec, b_spec,   # wo, bo
        ],
        out_specs=[
            pl.BlockSpec((b_tile, L, H), lambda b: (b, 0, 0)),              # x
            pl.BlockSpec((b_tile, n_heads, L, L), lambda b: (b, 0, 0, 0)),  # attention
        ],
    )

    fn = pl.pallas_call(
        kernel,
        out_shape=(
            jax.ShapeDtypeStruct((B, L, H), jnp.float32),
            jax.ShapeDtypeStruct((B, n_heads, L, L), attn_dtype),
        ),
        grid_spec=grid_spec,
        compiler_params=pltpu.CompilerParams(
            dimension_semantics=("parallel",),
            vmem_limit_bytes=vmem_limit,
        ),
    )

    return fn(qb, kb, vb, mask,
              wq, params["bq"], wk, params["bk"],
              wv, params["bv"], wo, params["bo"])


def mha_ref(query, key, value, mask, params, n_heads):
    """Pure-JAX f32 reference matching the PyTorch forward (dropout = identity)."""
    B, L, H = query.shape
    head_dim = H // n_heads
    scale = jnp.sqrt(jnp.float32(head_dim))

    def lin(x, w, b):
        return x @ w + b

    q = lin(query, params["wq"], params["bq"]).reshape(B, L, n_heads, head_dim).transpose(0, 2, 1, 3)
    k = lin(key, params["wk"], params["bk"]).reshape(B, L, n_heads, head_dim).transpose(0, 2, 1, 3)
    v = lin(value, params["wv"], params["bv"]).reshape(B, L, n_heads, head_dim).transpose(0, 2, 1, 3)
    energy = jnp.einsum("bhqd,bhkd->bhqk", q, k) / scale
    if mask is not None:
        energy = jnp.where(mask == 0.0, -1e10, energy)
    attn = jax.nn.softmax(energy, axis=-1)
    x = jnp.einsum("bhqk,bhkd->bhqd", attn, v)
    x = x.transpose(0, 2, 1, 3).reshape(B, L, H)
    x = lin(x, params["wo"], params["bo"])
    return x, attn


def init_params(key, hid_dim):
    ks = jax.random.split(key, 6)
    s = 0.05
    return {
        "wq": s * jax.random.normal(ks[0], (hid_dim, hid_dim), jnp.float32),
        "wk": s * jax.random.normal(ks[1], (hid_dim, hid_dim), jnp.float32),
        "wv": s * jax.random.normal(ks[2], (hid_dim, hid_dim), jnp.float32),
        "wo": s * jax.random.normal(ks[3], (hid_dim, hid_dim), jnp.float32),
        "bq": s * jax.random.normal(ks[4], (1, hid_dim), jnp.float32),
        "bk": jnp.zeros((1, hid_dim), jnp.float32),
        "bv": s * jax.random.normal(ks[5], (1, hid_dim), jnp.float32),
        "bo": jnp.zeros((1, hid_dim), jnp.float32),
    }


if __name__ == "__main__":
    B, L, HID, N_HEADS = 2, 8, 32, 4

    key0 = jax.random.PRNGKey(0)
    kq, kk, kv, kp = jax.random.split(key0, 4)
    query = jax.random.normal(kq, (B, L, HID), jnp.float32)
    key_in = jax.random.normal(kk, (B, L, HID), jnp.float32)
    value = jax.random.normal(kv, (B, L, HID), jnp.float32)

    # mask: [B, 1, 1, L]; batch 1 has the last two key positions masked out
    mask = jnp.ones((B, 1, 1, L), jnp.float32)
    mask = mask.at[1, :, :, L - 2:].set(0.0)

    params = init_params(kp, HID)

    out, attn = mha_pallas(query, key_in, value, mask, params, N_HEADS)
    out = jax.block_until_ready(out)
    attn = jax.block_until_ready(attn)

    ref_out, ref_attn = mha_ref(query, key_in, value, mask, params, N_HEADS)
    assert out.shape == (B, L, HID)
    assert attn.shape == (B, N_HEADS, L, L)
    # bf16 MXU operands / bf16 attention writeback -> compare against the f32
    # reference with a bf16-appropriate tolerance.
    assert jnp.allclose(out, ref_out, rtol=2e-2, atol=2e-2), "output mismatch vs reference"
    assert jnp.allclose(attn.astype(jnp.float32), ref_attn, rtol=2e-2, atol=2e-2), \
        "attention mismatch vs reference"

    print("KERNEL_OK")
</pallas_src>

<mosaic_0001>
module attributes {stable_mosaic.version = 11 : i64} {
  func.func @kernel(%arg0: i32, %arg1: memref<1x8x32xbf16, #tpu.memory_space<vmem>>, %arg2: memref<1x8x32xbf16, #tpu.memory_space<vmem>>, %arg3: memref<1x8x32xbf16, #tpu.memory_space<vmem>>, %arg4: memref<1x1x1x8xf32, #tpu.memory_space<vmem>>, %arg5: memref<32x32xbf16, #tpu.memory_space<vmem>>, %arg6: memref<1x32xf32, #tpu.memory_space<vmem>>, %arg7: memref<32x32xbf16, #tpu.memory_space<vmem>>, %arg8: memref<1x32xf32, #tpu.memory_space<vmem>>, %arg9: memref<32x32xbf16, #tpu.memory_space<vmem>>, %arg10: memref<1x32xf32, #tpu.memory_space<vmem>>, %arg11: memref<32x32xbf16, #tpu.memory_space<vmem>>, %arg12: memref<1x32xf32, #tpu.memory_space<vmem>>, %arg13: memref<1x8x32xf32, #tpu.memory_space<vmem>>, %arg14: memref<1x4x8x8xbf16, #tpu.memory_space<vmem>>) attributes {dimension_semantics = [#tpu.dimension_semantics<parallel>], iteration_bounds = array<i64: 2>, scalar_prefetch = 0 : i64, scratch_operands = 0 : i64, tpu.core_type = #tpu.core_type<tc>, window_params = [{transform_indices = @transform_0, window_bounds = array<i64: 1, 8, 32>}, {transform_indices = @transform_1, window_bounds = array<i64: 1, 8, 32>}, {transform_indices = @transform_2, window_bounds = array<i64: 1, 8, 32>}, {transform_indices = @transform_3, window_bounds = array<i64: 1, 1, 1, 8>}, {pipeline_mode = #tpu.pipeline_mode<synchronous>, transform_indices = @transform_4, window_bounds = array<i64: 32, 32>}, {pipeline_mode = #tpu.pipeline_mode<synchronous>, transform_indices = @transform_5, window_bounds = array<i64: 1, 32>}, {pipeline_mode = #tpu.pipeline_mode<synchronous>, transform_indices = @transform_6, window_bounds = array<i64: 32, 32>}, {pipeline_mode = #tpu.pipeline_mode<synchronous>, transform_indices = @transform_7, window_bounds = array<i64: 1, 32>}, {pipeline_mode = #tpu.pipeline_mode<synchronous>, transform_indices = @transform_8, window_bounds = array<i64: 32, 32>}, {pipeline_mode = #tpu.pipeline_mode<synchronous>, transform_indices = @transform_9, window_bounds = array<i64: 1, 32>}, {pipeline_mode = #tpu.pipeline_mode<synchronous>, transform_indices = @transform_10, window_bounds = array<i64: 32, 32>}, {pipeline_mode = #tpu.pipeline_mode<synchronous>, transform_indices = @transform_11, window_bounds = array<i64: 1, 32>}, {transform_indices = @transform_12, window_bounds = array<i64: 1, 8, 32>}, {transform_indices = @transform_13, window_bounds = array<i64: 1, 4, 8, 8>}]} {
    %c0 = arith.constant 0 : index
    %c0_0 = arith.constant 0 : index
    %c0_1 = arith.constant 0 : index
    %0 = vector.load %arg1[%c0, %c0_0, %c0_1] : memref<1x8x32xbf16, #tpu.memory_space<vmem>>, vector<1x8x32xbf16>
    %1 = vector.shape_cast %0 : vector<1x8x32xbf16> to vector<8x32xbf16>
    %c0_2 = arith.constant 0 : index
    %c0_3 = arith.constant 0 : index
    %c0_4 = arith.constant 0 : index
    %2 = vector.load %arg2[%c0_2, %c0_3, %c0_4] : memref<1x8x32xbf16, #tpu.memory_space<vmem>>, vector<1x8x32xbf16>
    %3 = vector.shape_cast %2 : vector<1x8x32xbf16> to vector<8x32xbf16>
    %c0_5 = arith.constant 0 : index
    %c0_6 = arith.constant 0 : index
    %c0_7 = arith.constant 0 : index
    %4 = vector.load %arg3[%c0_5, %c0_6, %c0_7] : memref<1x8x32xbf16, #tpu.memory_space<vmem>>, vector<1x8x32xbf16>
    %5 = vector.shape_cast %4 : vector<1x8x32xbf16> to vector<8x32xbf16>
    %c0_8 = arith.constant 0 : index
    %c0_9 = arith.constant 0 : index
    %6 = vector.load %arg5[%c0_8, %c0_9] : memref<32x32xbf16, #tpu.memory_space<vmem>>, vector<32x32xbf16>
    %cst = arith.constant dense<0.000000e+00> : vector<8x32xf32>
    %7 = tpu.matmul %1, %6, %cst {dimension_numbers = #tpu.dot_dimension_numbers<[1], [0], [0], [1], [0, 0, 1, 1], [], []>} : vector<8x32xbf16>, vector<32x32xbf16>, vector<8x32xf32> -> vector<8x32xf32>
    %c0_10 = arith.constant 0 : index
    %c0_11 = arith.constant 0 : index
    %8 = vector.load %arg6[%c0_10, %c0_11] : memref<1x32xf32, #tpu.memory_space<vmem>>, vector<1x32xf32>
    %9 = vector.broadcast %8 : vector<1x32xf32> to vector<8x32xf32>
    %10 = arith.addf %7, %9 : vector<8x32xf32>
    %c0_12 = arith.constant 0 : index
    %c0_13 = arith.constant 0 : index
    %11 = vector.load %arg7[%c0_12, %c0_13] : memref<32x32xbf16, #tpu.memory_space<vmem>>, vector<32x32xbf16>
    %cst_14 = arith.constant dense<0.000000e+00> : vector<8x32xf32>
    %12 = tpu.matmul %3, %11, %cst_14 {dimension_numbers = #tpu.dot_dimension_numbers<[1], [0], [0], [1], [0, 0, 1, 1], [], []>} : vector<8x32xbf16>, vector<32x32xbf16>, vector<8x32xf32> -> vector<8x32xf32>
    %c0_15 = arith.constant 0 : index
    %c0_16 = arith.constant 0 : index
    %13 = vector.load %arg8[%c0_15, %c0_16] : memref<1x32xf32, #tpu.memory_space<vmem>>, vector<1x32xf32>
    %14 = vector.broadcast %13 : vector<1x32xf32> to vector<8x32xf32>
    %15 = arith.addf %12, %14 : vector<8x32xf32>
    %c0_17 = arith.constant 0 : index
    %c0_18 = arith.constant 0 : index
    %16 = vector.load %arg9[%c0_17, %c0_18] : memref<32x32xbf16, #tpu.memory_space<vmem>>, vector<32x32xbf16>
    %cst_19 = arith.constant dense<0.000000e+00> : vector<8x32xf32>
    %17 = tpu.matmul %5, %16, %cst_19 {dimension_numbers = #tpu.dot_dimension_numbers<[1], [0], [0], [1], [0, 0, 1, 1], [], []>} : vector<8x32xbf16>, vector<32x32xbf16>, vector<8x32xf32> -> vector<8x32xf32>
    %c0_20 = arith.constant 0 : index
    %c0_21 = arith.constant 0 : index
    %18 = vector.load %arg10[%c0_20, %c0_21] : memref<1x32xf32, #tpu.memory_space<vmem>>, vector<1x32xf32>
    %19 = vector.broadcast %18 : vector<1x32xf32> to vector<8x32xf32>
    %20 = arith.addf %17, %19 : vector<8x32xf32>
    %21 = vector.shape_cast %10 : vector<8x32xf32> to vector<1x8x4x8xf32>
    %22 = tpu.transpose %21, [0, 2, 1, 3] : vector<1x8x4x8xf32> -> vector<1x4x8x8xf32>
    %23 = vector.shape_cast %22 : vector<1x4x8x8xf32> to vector<4x8x8xf32>
    %24 = arith.truncf %23 : vector<4x8x8xf32> to vector<4x8x8xbf16>
    %25 = vector.shape_cast %15 : vector<8x32xf32> to vector<1x8x4x8xf32>
    %26 = tpu.transpose %25, [0, 2, 1, 3] : vector<1x8x4x8xf32> -> vector<1x4x8x8xf32>
    %27 = vector.shape_cast %26 : vector<1x4x8x8xf32> to vector<4x8x8xf32>
    %28 = arith.truncf %27 : vector<4x8x8xf32> to vector<4x8x8xbf16>
    %29 = vector.shape_cast %20 : vector<8x32xf32> to vector<1x8x4x8xf32>
    %30 = tpu.transpose %29, [0, 2, 1, 3] : vector<1x8x4x8xf32> -> vector<1x4x8x8xf32>
    %31 = vector.shape_cast %30 : vector<1x4x8x8xf32> to vector<4x8x8xf32>
    %32 = arith.truncf %31 : vector<4x8x8xf32> to vector<4x8x8xbf16>
    %c0_22 = arith.constant 0 : index
    %c0_23 = arith.constant 0 : index
    %c0_24 = arith.constant 0 : index
    %c0_25 = arith.constant 0 : index
    %33 = vector.load %arg4[%c0_22, %c0_23, %c0_24, %c0_25] : memref<1x1x1x8xf32, #tpu.memory_space<vmem>>, vector<1x1x1x8xf32>
    %cst_26 = arith.constant 0.000000e+00 : f32
    %34 = vector.broadcast %cst_26 : f32 to vector<1x1x1x8xf32>
    %35 = arith.cmpf oeq, %33, %34 : vector<1x1x1x8xf32>
    %cst_27 = arith.constant -1.000000e+10 : f32
    %cst_28 = arith.constant 0.000000e+00 : f32
    %36 = vector.broadcast %cst_27 : f32 to vector<1x1x1x8xf32>
    %37 = vector.broadcast %cst_28 : f32 to vector<1x1x1x8xf32>
    %38 = arith.select %35, %36, %37 : vector<1x1x1x8xi1>, vector<1x1x1x8xf32>
    "tpu.trace_start"() <{level = 10 : i32, message = "bqd,bkd->bqk"}> : () -> ()
    %cst_29 = arith.constant dense<0.000000e+00> : vector<4x8x8xf32>
    %39 = tpu.matmul %24, %28, %cst_29 {dimension_numbers = #tpu.dot_dimension_numbers<[2], [2], [1], [1], [0, 0, 0, 1, 1, 1], [0], [0]>} : vector<4x8x8xbf16>, vector<4x8x8xbf16>, vector<4x8x8xf32> -> vector<4x8x8xf32>
    "tpu.trace_stop"() : () -> ()
    %cst_30 = arith.constant 0.353553385 : f32
    %40 = vector.broadcast %cst_30 : f32 to vector<4x8x8xf32>
    %41 = arith.mulf %39, %40 : vector<4x8x8xf32>
    %42 = vector.shape_cast %41 : vector<4x8x8xf32> to vector<1x4x8x8xf32>
    %43 = vector.broadcast %38 : vector<1x1x1x8xf32> to vector<1x4x8x8xf32>
    %44 = arith.addf %42, %43 : vector<1x4x8x8xf32>
    %cst_31 = arith.constant dense<0xFF800000> : vector<1x4x8xf32>
    %45 = vector.multi_reduction <maximumf>, %44, %cst_31 [3] : vector<1x4x8x8xf32> to vector<1x4x8xf32>
    %46 = vector.shape_cast %45 : vector<1x4x8xf32> to vector<1x4x8x1xf32>
    %47 = vector.broadcast %46 : vector<1x4x8x1xf32> to vector<1x4x8x8xf32>
    %48 = arith.subf %44, %47 : vector<1x4x8x8xf32>
    %49 = math.exp %48 : vector<1x4x8x8xf32>
    %cst_32 = arith.constant dense<0.000000e+00> : vector<1x4x8xf32>
    %50 = vector.multi_reduction <add>, %49, %cst_32 [3] : vector<1x4x8x8xf32> to vector<1x4x8xf32>
    %51 = vector.shape_cast %50 : vector<1x4x8xf32> to vector<1x4x8x1xf32>
    %52 = tpu.reciprocal %51 : vector<1x4x8x1xf32> -> vector<1x4x8x1xf32>
    %53 = vector.broadcast %52 : vector<1x4x8x1xf32> to vector<1x4x8x8xf32>
    %54 = arith.mulf %49, %53 : vector<1x4x8x8xf32>
    %55 = arith.truncf %54 : vector<1x4x8x8xf32> to vector<1x4x8x8xbf16>
    %c0_33 = arith.constant 0 : index
    %c0_34 = arith.constant 0 : index
    %c0_35 = arith.constant 0 : index
    %c0_36 = arith.constant 0 : index
    %56 = vector.load %arg14[%c0_33, %c0_34, %c0_35, %c0_36] : memref<1x4x8x8xbf16, #tpu.memory_space<vmem>>, vector<1x4x8x8xbf16>
    tpu.vector_store %arg14[%c0_33, %c0_34, %c0_35, %c0_36], %55 {strides = array<i32>} : memref<1x4x8x8xbf16, #tpu.memory_space<vmem>>, vector<1x4x8x8xbf16>,
    %57 = vector.shape_cast %54 : vector<1x4x8x8xf32> to vector<4x8x8xf32>
    %58 = arith.truncf %57 : vector<4x8x8xf32> to vector<4x8x8xbf16>
    "tpu.trace_start"() <{level = 10 : i32, message = "bqk,bkd->bqd"}> : () -> ()
    %cst_37 = arith.constant dense<0.000000e+00> : vector<4x8x8xf32>
    %59 = tpu.matmul %58, %32, %cst_37 {dimension_numbers = #tpu.dot_dimension_numbers<[2], [1], [1], [2], [0, 0, 0, 1, 1, 2], [0], [0]>} : vector<4x8x8xbf16>, vector<4x8x8xbf16>, vector<4x8x8xf32> -> vector<4x8x8xf32>
    "tpu.trace_stop"() : () -> ()
    %60 = vector.shape_cast %59 : vector<4x8x8xf32> to vector<1x4x8x8xf32>
    %61 = tpu.transpose %60, [0, 2, 1, 3] : vector<1x4x8x8xf32> -> vector<1x8x4x8xf32>
    %62 = vector.shape_cast %61 : vector<1x8x4x8xf32> to vector<8x32xf32>
    %63 = arith.truncf %62 : vector<8x32xf32> to vector<8x32xbf16>
    %c0_38 = arith.constant 0 : index
    %c0_39 = arith.constant 0 : index
    %64 = vector.load %arg11[%c0_38, %c0_39] : memref<32x32xbf16, #tpu.memory_space<vmem>>, vector<32x32xbf16>
    %cst_40 = arith.constant dense<0.000000e+00> : vector<8x32xf32>
    %65 = tpu.matmul %63, %64, %cst_40 {dimension_numbers = #tpu.dot_dimension_numbers<[1], [0], [0], [1], [0, 0, 1, 1], [], []>} : vector<8x32xbf16>, vector<32x32xbf16>, vector<8x32xf32> -> vector<8x32xf32>
    %c0_41 = arith.constant 0 : index
    %c0_42 = arith.constant 0 : index
    %66 = vector.load %arg12[%c0_41, %c0_42] : memref<1x32xf32, #tpu.memory_space<vmem>>, vector<1x32xf32>
    %67 = vector.broadcast %66 : vector<1x32xf32> to vector<8x32xf32>
    %68 = arith.addf %65, %67 : vector<8x32xf32>
    %69 = vector.shape_cast %68 : vector<8x32xf32> to vector<1x8x32xf32>
    %c0_43 = arith.constant 0 : index
    %c0_44 = arith.constant 0 : index
    %c0_45 = arith.constant 0 : index
    %70 = vector.load %arg13[%c0_43, %c0_44, %c0_45] : memref<1x8x32xf32, #tpu.memory_space<vmem>>, vector<1x8x32xf32>
    tpu.vector_store %arg13[%c0_43, %c0_44, %c0_45], %69 {strides = array<i32>} : memref<1x8x32xf32, #tpu.memory_space<vmem>>, vector<1x8x32xf32>,
    return
  }
  func.func @transform_0(%arg0: i32) -> (i32, i32, i32) {
    %c0_i32 = arith.constant 0 : i32
    %c0_i32_0 = arith.constant 0 : i32
    %c0_i32_1 = arith.constant 0 : i32
    return %arg0, %c0_i32, %c0_i32_0 : i32, i32, i32
  }
  func.func @transform_1(%arg0: i32) -> (i32, i32, i32) {
    %c0_i32 = arith.constant 0 : i32
    %c0_i32_0 = arith.constant 0 : i32
    %c0_i32_1 = arith.constant 0 : i32
    return %arg0, %c0_i32, %c0_i32_0 : i32, i32, i32
  }
  func.func @transform_2(%arg0: i32) -> (i32, i32, i32) {
    %c0_i32 = arith.constant 0 : i32
    %c0_i32_0 = arith.constant 0 : i32
    %c0_i32_1 = arith.constant 0 : i32
    return %arg0, %c0_i32, %c0_i32_0 : i32, i32, i32
  }
  func.func @transform_3(%arg0: i32) -> (i32, i32, i32, i32) {
    %c0_i32 = arith.constant 0 : i32
    %c0_i32_0 = arith.constant 0 : i32
    %c0_i32_1 = arith.constant 0 : i32
    %c0_i32_2 = arith.constant 0 : i32
    return %arg0, %c0_i32, %c0_i32_0, %c0_i32_1 : i32, i32, i32, i32
  }
  func.func @transform_4(%arg0: i32) -> (i32, i32) {
    %c0_i32 = arith.constant 0 : i32
    %c0_i32_0 = arith.constant 0 : i32
    %c0_i32_1 = arith.constant 0 : i32
    return %c0_i32, %c0_i32_0 : i32, i32
  }
  func.func @transform_5(%arg0: i32) -> (i32, i32) {
    %c0_i32 = arith.constant 0 : i32
    %c0_i32_0 = arith.constant 0 : i32
    %c0_i32_1 = arith.constant 0 : i32
    return %c0_i32, %c0_i32_0 : i32, i32
  }
  func.func @transform_6(%arg0: i32) -> (i32, i32) {
    %c0_i32 = arith.constant 0 : i32
    %c0_i32_0 = arith.constant 0 : i32
    %c0_i32_1 = arith.constant 0 : i32
    return %c0_i32, %c0_i32_0 : i32, i32
  }
  func.func @transform_7(%arg0: i32) -> (i32, i32) {
    %c0_i32 = arith.constant 0 : i32
    %c0_i32_0 = arith.constant 0 : i32
    %c0_i32_1 = arith.constant 0 : i32
    return %c0_i32, %c0_i32_0 : i32, i32
  }
  func.func @transform_8(%arg0: i32) -> (i32, i32) {
    %c0_i32 = arith.constant 0 : i32
    %c0_i32_0 = arith.constant 0 : i32
    %c0_i32_1 = arith.constant 0 : i32
    return %c0_i32, %c0_i32_0 : i32, i32
  }
  func.func @transform_9(%arg0: i32) -> (i32, i32) {
    %c0_i32 = arith.constant 0 : i32
    %c0_i32_0 = arith.constant 0 : i32
    %c0_i32_1 = arith.constant 0 : i32
    return %c0_i32, %c0_i32_0 : i32, i32
  }
  func.func @transform_10(%arg0: i32) -> (i32, i32) {
    %c0_i32 = arith.constant 0 : i32
    %c0_i32_0 = arith.constant 0 : i32
    %c0_i32_1 = arith.constant 0 : i32
    return %c0_i32, %c0_i32_0 : i32, i32
  }
  func.func @transform_11(%arg0: i32) -> (i32, i32) {
    %c0_i32 = arith.constant 0 : i32
    %c0_i32_0 = arith.constant 0 : i32
    %c0_i32_1 = arith.constant 0 : i32
    return %c0_i32, %c0_i32_0 : i32, i32
  }
  func.func @transform_12(%arg0: i32) -> (i32, i32, i32) {
    %c0_i32 = arith.constant 0 : i32
    %c0_i32_0 = arith.constant 0 : i32
    %c0_i32_1 = arith.constant 0 : i32
    return %arg0, %c0_i32, %c0_i32_0 : i32, i32, i32
  }
  func.func @transform_13(%arg0: i32) -> (i32, i32, i32, i32) {
    %c0_i32 = arith.constant 0 : i32
    %c0_i32_0 = arith.constant 0 : i32
    %c0_i32_1 = arith.constant 0 : i32
    %c0_i32_2 = arith.constant 0 : i32
    return %arg0, %c0_i32, %c0_i32_0, %c0_i32_1 : i32, i32, i32, i32
  }
}

</mosaic_0001>

<bundles_post_ra>
// kernel: tpu_custom_call.1
= control target key start
LH: loop header
LB: loop body
LE: loop exit
PB: predicated region body
PF: predicated region fallthrough
CT: control target
= control target key end

     0   :  { %s3539_s0 = inlined_call_operand.hbm [shape: bf16[2,8,32], index: 0, kind: input, shape index: {}]   ;;  %s3540_s1 = inlined_call_operand.hbm [shape: bf16[2,8,32], index: 1, kind: input, shape index: {}]   ;;  %s3541_s2 = inlined_call_operand.hbm [shape: bf16[2,8,32], index: 2, kind: input, shape index: {}]   ;;  %s3542_s3 = inlined_call_operand.vmem [shape: f32[2,1,1,8], index: 3, kind: input, shape index: {}]   ;;  %s3543_s4 = inlined_call_operand.hbm [shape: bf16[32,32], index: 4, kind: input, shape index: {}]   ;;  %s3544_s5 = inlined_call_operand.hbm [shape: f32[1,32], index: 5, kind: input, shape index: {}]   ;;  %s3545_s6 = inlined_call_operand.vmem [shape: bf16[32,32], index: 6, kind: input, shape index: {}]   ;;  %s3546_s7 = inlined_call_operand.hbm [shape: f32[1,32], index: 7, kind: input, shape index: {}]   ;;  %s3547_s8 = inlined_call_operand.hbm [shape: bf16[32,32], index: 8, kind: input, shape index: {}]   ;;  %s3548_s9 = inlined_call_operand.hbm [shape: f32[1,32], index: 9, kind: input, shape index: {}]   ;;  %s3549_s10 = inlined_call_operand.vmem [shape: bf16[32,32], index: 10, kind: input, shape index: {}]   ;;  %s3550_s11 = inlined_call_operand.vmem [shape: f32[1,32], index: 11, kind: input, shape index: {}]   ;;  %s3551_s12 = inlined_call_operand.hbm [shape: f32[2,8,32], index: 12, kind: output, shape index: {0}]   ;;  %s3552_s13 = inlined_call_operand.hbm [shape: bf16[2,4,8,8], index: 13, kind: output, shape index: {1}]  }
   0x1   :  { %3578 = sst [smem:[#allocation32_spill]] %s3540_s1 }
   0x2   :  { %3579 = sst [smem:[#allocation33_spill]] %s3542_s3 }
   0x3   :  { %3580 = sst [smem:[#allocation34_spill]] %s3543_s4 }
   0x4   :  { %3581 = sst [smem:[#allocation35_spill]] %s3546_s7 }
   0x5   :  { %3582 = sst [smem:[#allocation36_spill]] %s3549_s10 }
   0x6   :  { %3583 = sst [smem:[#allocation37_spill]] %s3550_s11 }
   0x7   :  { %3584 = sst [smem:[#allocation38_spill]] %s3551_s12 }
   0x8   :  { %3585 = sst [smem:[#allocation39_spill]] %s3552_s13 }
   0x9   :  { %19 = vsyncpa [#allocation3], 0 }
   0xa   :  { %21 = vsyncpa [#allocation3 + $0x1], 0 }
   0xb   :  { %22 = vsyncpa [#allocation6], 0 }
   0xc   :  { %24 = vsyncpa [#allocation6 + $0x1], 0 }
   0xd   :  { %25 = vsyncpa [#allocation9], 0 }
   0xe   :  { %26 = vsyncpa [#allocation12], 0 }
   0xf   :  { %27 = vsyncpa [#allocation15], 0 }
  0x10   :  { %28 = vsyncpa [#allocation4], 0 }
  0x11   :  { %30 = vsyncpa [#allocation4 + $0x1], 0 }
  0x12   :  { %31 = vsyncpa [#allocation18], 0 }
  0x13   :  { %33 = vsyncpa [#allocation18 + $0x1], 0  ;;  %s2933_s25 = smov 0   ;;  %s2935_s26 = smov 0  }
  0x14   :  { %s2937_s27 = smov 0   ;;  %s2939_s28 = smov 0  }
  0x15 LB: > { %3586 = sst [smem:[#allocation26_spill]] %s2825_s25  ;;  %s2839_s29 = smov [#allocation8]   ;;  %s2837_s28 = sphi %s2939_s28, %s3631_s28   ;;  %s2833_s27 = sphi %s2937_s27, %s3635_s27   ;;  %s2829_s26 = sphi %s2935_s26, %s3634_s26   ;;  %s2825_s25 = sphi %s2933_s25, %s3633_s25  }
  0x16   : > { %3587 = sst [smem:[#allocation27_spill]] %s2837_s28  ;;  %s380_s30 = sshll.u32 %s2839_s29, 4  ;;  %s2959_s30 = int_to_ptr.vmem [resolvable:$true] %s380_s30 }
  0x17   : > { %s2954_s14 = sadd.s32 4294967295, %s2837_s28   ;;  %p2171_p0 = scmp.ge.s32.totalorder %s2837_s28, 1 }
  0x18   : > { %p3565_p1 = scmp.eq.s32.totalorder %s2954_s14, 0  ;;  %p368_p2 = scmp.lt.s32.totalorder %s2837_s28, 3 }
  0x19   : > { %s2840_s16 = smov [#allocation11]   ;;  %s3590_s4 = sld [smem:[#allocation34_spill]] }
  0x1a   : > { %p2961_p3 = pnand %p2171_p0, %p368_p2  ;;  %s408_s17 = sshll.u32 %s2840_s16, 4  ;;  %s2974_s17 = int_to_ptr.vmem [resolvable:$true] %s408_s17 }
  0x1c   : > { %s3588_s15 = scalar_select %p2961_p3, 1, 0 }
  0x1d   : > { %p2373_p5 = pneg %p2961_p3 }
  0x1f   : > { %p2970_p6 = pnand %p2373_p5, %p3565_p1  ;;  %s2493_s21 = scalar_lea.hbm %s3590_s4, 256 }
  0x20   : > { %p2494_p7 = scmp.ne.s32.totalorder %s3590_s4, %s2493_s21  ;;  %p2500_p11 = scmp.lt.u32.totalorder %s2493_s21, %s3590_s4 }
  0x21   : > { %s3589_s18 = scalar_select %p2970_p6, 1, 0 }
  0x22   : > { %p2984_p8 = pneg %p2970_p6 }
  0x24   : > { %s3591_s24 = scalar_select %p2984_p8, 1, 0 }
  0x25   : > { %p2496_p9 = pnand %p2984_p8, %p2494_p7 }
  0x27   : > { %p2497_p10 = pneg %p2496_p9 }
  0x29   : > { %p2502_p12 = pnand %p2500_p11, %p2497_p10 }
  0x2b   : > { %2505 = shalt.err (!%p2502_p12)
}
  0x2c   : > { %s2506_s19 = scalar_lea.vmem %s2959_s30, 256  ;;  %p2514_p5 = scmp.lt.s32.totalorder %s2959_s30, %s2959_s30 }
  0x2d   : > { %p2507_p13 = scmp.ne.s32.totalorder %s2959_s30, %s2506_s19  ;;  %p2515_p4 = scmp.lt.s32.totalorder %s2506_s19, %s2506_s19 }
  0x2f   : > { %p2509_p0 = pnand %p2507_p13, %p2984_p8  ;;  %p2516_p7 = por %p2515_p4, %p2514_p5 }
  0x31   : > { %p2510_p2 = pneg %p2509_p0 }
  0x33   : > { %p2517_p9 = pnand %p2516_p7, %p2510_p2 }
  0x35   : > { %2520 = shalt.err (!%p2517_p9)
}
  0x36   : > { %s3557_s20 = smov 64   ;;  %s3558_s21 = smov 4  }
  0x37   : > { %2376 = dma.hbm_to_vmem [thread:$0]  (!%p2970_p6), %s3590_s4, 256, %s2959_s30, [#allocation9], %s3557_s20, %s3557_s20, %s3558_s21  }
  0x38   : > { %s3592_s7 = sld [smem:[#allocation35_spill]] }
  0x3e   : > { %s2521_s19 = scalar_lea.hbm %s3592_s7, 16 }
  0x3f   : > { %p2522_p4 = scmp.ne.s32.totalorder %s3592_s7, %s2521_s19  ;;  %p2528_p12 = scmp.lt.u32.totalorder %s2521_s19, %s3592_s7 }
  0x41   : > { %p2524_p10 = pnand %p2522_p4, %p2984_p8 }
  0x43   : > { %p2525_p11 = pneg %p2524_p10 }
  0x45   : > { %p2530_p13 = pnand %p2528_p12, %p2525_p11 }
  0x47   : > { %2533 = shalt.err (!%p2530_p13)
}
  0x48   : > { %s2534_s30 = scalar_lea.vmem %s2974_s17, 16  ;;  %s2541_s11 = scalar_lea.vmem %s2974_s17, 32 }
  0x49   : > { %p2535_p0 = scmp.ne.s32.totalorder %s2974_s17, %s2534_s30  ;;  %p2542_p7 = scmp.lt.s32.totalorder %s2974_s17, %s2974_s17 }
  0x4a   : > { %p2543_p9 = scmp.lt.s32.totalorder %s2541_s11, %s2534_s30 }
  0x4b   : > { %p2537_p2 = pnand %p2535_p0, %p2984_p8 }
  0x4c   : > { %p2544_p4 = por %p2543_p9, %p2542_p7 }
  0x4d   : > { %p2538_p5 = pneg %p2537_p2 }
  0x4f   : > { %p2545_p10 = pnand %p2544_p4, %p2538_p5 }
  0x51   : > { %2548 = shalt.err (!%p2545_p10)
}
  0x52   : > { %2382 = dma.hbm_to_vmem [thread:$0]  (!%p2970_p6), %s3592_s7, 16, %s2974_s17, [#allocation12]  }
  0x53   : > { %s2170_s13 = sadd.s32 4294967294, %s2837_s28   ;;  %s3034_s22 = sadd.s32 1, %s2837_s28  }
  0x54   : > { %3593 = sst [smem:[#allocation28_spill]] %s3034_s22  ;;  %s43_s23 = ssub.s32 %s2837_s28, %s3034_s22 }
  0x55   : > { %s46_s29 = sadd.s32 1, %s2833_s27  ;;  %p44_p11 = scmp.eq.s32.totalorder %s43_s23, 0 }
  0x56   : > { %p53_p12 = scmp.ne.s32.totalorder %s2833_s27, %s2829_s26  ;;  %p54_p13 = scmp.eq.s32.totalorder %s2837_s28, 0 }
  0x57   : > { %p59_p0 = scmp.ne.s32.totalorder %s2829_s26, %s2825_s25  ;;  %p329_p7 = scmp.eq.s32.totalorder %s2954_s14, 1 }
  0x58   : > { %s3045_s16 = scalar_select %p44_p11, %s2833_s27, %s46_s29  }
  0x59   : > { %p55_p2 = por %p54_p13, %p53_p12  ;;  %p3049_p5 = por %p3565_p1, %p59_p0 }
  0x5a   : > { %3594 = sst [smem:[#allocation29_spill]] %s3045_s16  ;;  %p335_p9 = scmp.eq.s32.totalorder %s2170_s13, 1 }
  0x5b   : > { %s3595_s19 = scalar_select %p3049_p5, 1, 0 }
  0x5c   : > { %p2411_p4 = scmp.lt.s32.totalorder %s2837_s28, 2  ;;  %s3559_s17 = sand.u32 1, %s2833_s27  }
  0x5d   : > { %p3056_p10 = por %p329_p7, %p53_p12  ;;  %p3060_p3 = por %p335_p9, %p59_p0 }
  0x5e   : > { %s3066_s10 = sshll.u32 %s3559_s17, 2  ;;  %s3069_s12 = sshll.u32 %s2837_s28, 6 }
  0x5f   : > { %s3596_s30 = scalar_select %p3056_p10, 1, 0 }
  0x60   : > { %s3598_s11 = scalar_select %p3060_p3, 1, 0 }
  0x61   : > { %3597 = sst [smem:[#allocation30_spill]] %s3596_s30  ;;  %p3071_p11 = pnand %p2411_p4, %p55_p2 }
  0x62   : > { %3599 = sst [smem:[#allocation31_spill]] %s3598_s11  ;;  %s467_s13 = sand.u32 1, %s2837_s28  }
  0x63   : > { %s3600_s23 = scalar_select %p3071_p11, 1, 0 }
  0x64   : > { %s3601_s1 = sld [smem:[#allocation32_spill]]  ;;  %s471_s17 = scalar_lea.vmem [#allocation5], %s3066_s10 }
  0x65   : > { %s478_s4 = sshll.u32 %s471_s17, 4  ;;  %s2843_s7 = smov [#allocation10]   ;;  %s3083_s4 = int_to_ptr.vmem [resolvable:$true] %s478_s4 }
  0x66   : > { %s3085_s16 = sshll.u32 %s2843_s7, 4  ;;  %s3087_s22 = scalar_lea.sflag [#allocation6], %s467_s13  ;;  %s395_s16 = int_to_ptr.vmem [resolvable:$true] %s3085_s16 }
  0x67   : > { %p3093_p13 = pneg %p3071_p11 }
  0x69   : > { %s3602_s20 = scalar_select %p3093_p13, 1, 0 }
  0x6a   : > { %s3080_s21 = scalar_lea.hbm %s3601_s1, %s3069_s12  ;;  %s2554_s28 = scalar_lea.hbm %s3601_s1, 128 }
  0x6b   : > { %s2549_s11 = scalar_lea.hbm %s3080_s21, 64  ;;  %p2555_p7 = scmp.lt.u32.totalorder %s3080_s21, %s3601_s1 }
  0x6c   : > { %p2550_p12 = scmp.ne.s32.totalorder %s3080_s21, %s2549_s11  ;;  %p2556_p9 = scmp.lt.u32.totalorder %s2554_s28, %s2549_s11 }
  0x6d   : > { %p2558_p1 = scmp.lt.u32.totalorder %s2549_s11, %s3080_s21 }
  0x6e   : > { %p2552_p0 = pnand %p3093_p13, %p2550_p12  ;;  %p2557_p4 = por %p2556_p9, %p2555_p7 }
  0x70   : > { %p2553_p2 = pneg %p2552_p0  ;;  %p2559_p3 = por %p2558_p1, %p2557_p4 }
  0x72   : > { %p2560_p10 = pnand %p2559_p3, %p2553_p2 }
  0x74   : > { %2563 = shalt.err (!%p2560_p10)
}
  0x75   : > { %s2564_s13 = scalar_lea.vmem %s3083_s4, 64  ;;  %s2844_s29 = smov [#allocation5]  }
  0x76   : > { %p2565_p12 = scmp.ne.s32.totalorder %s3083_s4, %s2564_s13  ;;  %s2569_s17 = sshll.u32 %s2844_s29, 4  ;;  %s2570_s17 = int_to_ptr.vmem [resolvable:$false] %s2569_s17 }
  0x77   : > { %s2571_s25 = scalar_lea.vmem %s2570_s17, 128  ;;  %p2572_p6 = scmp.lt.s32.totalorder %s3083_s4, %s2570_s17 }
  0x78   : > { %p2567_p0 = pnand %p2565_p12, %p3093_p13  ;;  %p2573_p8 = scmp.lt.s32.totalorder %s2571_s25, %s2564_s13 }
  0x7a   : > { %p2568_p5 = pneg %p2567_p0  ;;  %p2574_p7 = por %p2573_p8, %p2572_p6 }
  0x7c   : > { %p2575_p9 = pnand %p2574_p7, %p2568_p5 }
  0x7e   : > { %2578 = shalt.err (!%p2575_p9)
}
  0x7f   : > { %2395 = dma.hbm_to_vmem [thread:$0]  (!%p3071_p11), %s3080_s21, 64, %s3083_s4, %s3087_s22  }
  0x80   : > { %s2579_s7 = scalar_lea.hbm %s3544_s5, 16  ;;  %p3603_p3 = scmp.ne.s32.totalorder %s3591_s24, 0 }
  0x81   : > { %p2580_p1 = scmp.ne.s32.totalorder %s3544_s5, %s2579_s7  ;;  %p2586_p5 = scmp.lt.u32.totalorder %s2579_s7, %s3544_s5 }
  0x83   : > { %p2582_p6 = pnand %p2580_p1, %p3603_p3 }
  0x85   : > { %p2583_p8 = pneg %p2582_p6 }
  0x87   : > { %p2588_p10 = pnand %p2586_p5, %p2583_p8 }
  0x89   : > { %2591 = shalt.err (!%p2588_p10)
}
  0x8a   : > { %s2592_s25 = scalar_lea.vmem %s395_s16, 16  ;;  %s2599_s4 = scalar_lea.vmem %s395_s16, 32 }
  0x8b   : > { %p2593_p2 = scmp.ne.s32.totalorder %s395_s16, %s2592_s25  ;;  %p2600_p0 = scmp.lt.s32.totalorder %s395_s16, %s395_s16 }
  0x8c   : > { %p2601_p7 = scmp.lt.s32.totalorder %s2599_s4, %s2592_s25 }
  0x8d   : > { %p2595_p4 = pnand %p2593_p2, %p3603_p3 }
  0x8e   : > { %p2602_p9 = por %p2601_p7, %p2600_p0 }
  0x8f   : > { %p2596_p12 = pneg %p2595_p4 }
  0x91   : > { %p2603_p11 = pnand %p2602_p9, %p2596_p12 }
  0x93   : > { %2606 = shalt.err (!%p2603_p11)
}
  0x94   : > { %p3604_p1 = scmp.ne.s32.totalorder %s3589_s18, 0  ;;  %s2845_s28 = smov [#allocation13]  }
  0x95   : > { %s418_s11 = sshll.u32 %s2845_s28, 4  ;;  %s2846_s7 = smov [#allocation14]   ;;  %s419_s11 = int_to_ptr.vmem [resolvable:$true] %s418_s11 }
  0x96   : > { %2379 = dma.hbm_to_vmem [thread:$0]  (!%p3604_p1), %s3544_s5, 16, %s395_s16, [#allocation9]  }
  0x97   : > { %s432_s29 = sshll.u32 %s2846_s7, 4  ;;  %s2607_s30 = scalar_lea.hbm %s3547_s8, 256  ;;  %s433_s29 = int_to_ptr.vmem [resolvable:$true] %s432_s29 }
  0x98   : > { %p2608_p11 = scmp.ne.s32.totalorder %s3547_s8, %s2607_s30  ;;  %p2614_p5 = scmp.lt.u32.totalorder %s2607_s30, %s3547_s8 }
  0x9a   : > { %p2610_p6 = pnand %p2608_p11, %p3603_p3 }
  0x9c   : > { %p2611_p8 = pneg %p2610_p6 }
  0x9e   : > { %p2616_p10 = pnand %p2614_p5, %p2611_p8 }
  0xa0   : > { %2619 = shalt.err (!%p2616_p10)
}
  0xa1   : > { %s2620_s16 = scalar_lea.vmem %s419_s11, 256  ;;  %p2628_p0 = scmp.lt.s32.totalorder %s419_s11, %s419_s11 }
  0xa2   : > { %p2621_p2 = scmp.ne.s32.totalorder %s419_s11, %s2620_s16  ;;  %p2629_p7 = scmp.lt.s32.totalorder %s2620_s16, %s2620_s16 }
  0xa4   : > { %p2623_p4 = pnand %p2621_p2, %p3603_p3  ;;  %p2630_p9 = por %p2629_p7, %p2628_p0 }
  0xa6   : > { %p2624_p12 = pneg %p2623_p4 }
  0xa8   : > { %p2631_p13 = pnand %p2630_p9, %p2624_p12 }
  0xaa   : > { %2634 = shalt.err (!%p2631_p13)
}
  0xab   : > { %s3605_s21 = smov 4   ;;  %s3606_s28 = smov 64  }
  0xac   : > { %2385 = dma.hbm_to_vmem [thread:$0]  (!%p3604_p1), %s3547_s8, 256, %s419_s11, [#allocation12], %s3606_s28, %s3606_s28, %s3605_s21  }
  0xad   : > { %s2635_s17 = scalar_lea.hbm %s3548_s9, 16 }
  0xae   : > { %p2636_p11 = scmp.ne.s32.totalorder %s3548_s9, %s2635_s17  ;;  %p2642_p8 = scmp.lt.u32.totalorder %s2635_s17, %s3548_s9 }
  0xb0   : > { %p2638_p13 = pnand %p2636_p11, %p3603_p3 }
  0xb2   : > { %p2639_p6 = pneg %p2638_p13 }
  0xb4   : > { %p2644_p5 = pnand %p2642_p8, %p2639_p6 }
  0xb6   : > { %2647 = shalt.err (!%p2644_p5)
}
  0xb7   : > { %s2648_s3 = scalar_lea.vmem %s433_s29, 16  ;;  %s2655_s11 = scalar_lea.vmem %s433_s29, 32 }
  0xb8   : > { %p2649_p10 = scmp.ne.s32.totalorder %s433_s29, %s2648_s3  ;;  %p2656_p12 = scmp.lt.s32.totalorder %s433_s29, %s433_s29 }
  0xb9   : > { %p2657_p0 = scmp.lt.s32.totalorder %s2655_s11, %s2648_s3 }
  0xba   : > { %p2651_p2 = pnand %p2649_p10, %p3603_p3 }
  0xbb   : > { %p2658_p7 = por %p2657_p0, %p2656_p12 }
  0xbc   : > { %p2652_p4 = pneg %p2651_p2 }
  0xbe   : > { %p2659_p9 = pnand %p2658_p7, %p2652_p4 }
  0xc0   : > { %2662 = shalt.err (!%p2659_p9)
}
  0xc1   : > { %2388 = dma.hbm_to_vmem [thread:$0]  (!%p3604_p1), %s3548_s9, 16, %s433_s29, [#allocation15]  }
  0xc2   : > { %s3179_s7 = scalar_lea.hbm %s3539_s0, %s3069_s12  ;;  %s453_s13 = scalar_lea.vmem [#allocation2], %s3066_s10 }
  0xc3   : > { %s460_s18 = sshll.u32 %s453_s13, 4  ;;  %s3188_s4 = scalar_lea.hbm %s3541_s2, %s3069_s12  ;;  %s3182_s18 = int_to_ptr.vmem [resolvable:$true] %s460_s18 }
  0xc4   : > { %s3607_s1 = sand.u32 1, %s2833_s27   ;;  %s2663_s16 = scalar_lea.hbm %s3179_s7, 64 }
  0xc5   : > { %s450_s29 = scalar_lea.sflag [#allocation3], %s3607_s1  ;;  %p2664_p3 = scmp.ne.s32.totalorder %s3179_s7, %s2663_s16 }
  0xc6   : > { %p3608_p1 = scmp.ne.s32.totalorder %s3602_s20, 0  ;;  %s2668_s21 = scalar_lea.hbm %s3539_s0, 128 }
  0xc7   : > { %p2669_p6 = scmp.lt.u32.totalorder %s3179_s7, %s3539_s0  ;;  %p2670_p8 = scmp.lt.u32.totalorder %s2668_s21, %s2663_s16 }
  0xc8   : > { %p2666_p11 = pnand %p2664_p3, %p3608_p1  ;;  %p2672_p10 = scmp.lt.u32.totalorder %s2663_s16, %s3179_s7 }
  0xc9   : > { %p2671_p5 = por %p2670_p8, %p2669_p6 }
  0xca   : > { %p2667_p13 = pneg %p2666_p11 }
  0xcb   : > { %p2673_p2 = por %p2672_p10, %p2671_p5 }
  0xcd   : > { %p2674_p4 = pnand %p2673_p2, %p2667_p13 }
  0xcf   : > { %2677 = shalt.err (!%p2674_p4)
}
  0xd0   : > { %s2678_s12 = scalar_lea.vmem %s3182_s18, 64  ;;  %s2847_s30 = smov [#allocation2]  }
  0xd1   : > { %p2679_p12 = scmp.ne.s32.totalorder %s3182_s18, %s2678_s12  ;;  %s2683_s13 = sshll.u32 %s2847_s30, 4  ;;  %s2684_s13 = int_to_ptr.vmem [resolvable:$false] %s2683_s13 }
  0xd2   : > { %s2685_s17 = scalar_lea.vmem %s2684_s13, 128  ;;  %p2686_p9 = scmp.lt.s32.totalorder %s3182_s18, %s2684_s13 }
  0xd3   : > { %p2681_p0 = pnand %p2679_p12, %p3608_p1  ;;  %p2687_p3 = scmp.lt.s32.totalorder %s2685_s17, %s2678_s12 }
  0xd5   : > { %p2682_p7 = pneg %p2681_p0  ;;  %p2688_p11 = por %p2687_p3, %p2686_p9 }
  0xd7   : > { %p2689_p6 = pnand %p2688_p11, %p2682_p7 }
  0xd9   : > { %2692 = shalt.err (!%p2689_p6)
}
  0xda   : > { %p3609_p13 = scmp.ne.s32.totalorder %s3600_s23, 0  ;;  %s489_s25 = scalar_lea.vmem [#allocation7], %s3066_s10 }
  0xdb   : > { %s496_s1 = sshll.u32 %s489_s25, 4  ;;  %s2693_s16 = scalar_lea.hbm %s3188_s4, 64  ;;  %s497_s1 = int_to_ptr.vmem [resolvable:$true] %s496_s1 }
  0xdc   : > { %2392 = dma.hbm_to_vmem [thread:$0]  (!%p3609_p13), %s3179_s7, 64, %s3182_s18, %s450_s29  }
  0xdd   : > { %p2694_p8 = scmp.ne.s32.totalorder %s3188_s4, %s2693_s16  ;;  %s2698_s21 = scalar_lea.hbm %s3541_s2, 128 }
  0xde   : > { %p2699_p2 = scmp.lt.u32.totalorder %s3188_s4, %s3541_s2  ;;  %p2700_p4 = scmp.lt.u32.totalorder %s2698_s21, %s2693_s16 }
  0xdf   : > { %p2696_p5 = pnand %p2694_p8, %p3608_p1  ;;  %p2702_p0 = scmp.lt.u32.totalorder %s2693_s16, %s3188_s4 }
  0xe0   : > { %p2701_p12 = por %p2700_p4, %p2699_p2 }
  0xe1   : > { %p2697_p10 = pneg %p2696_p5 }
  0xe2   : > { %p2703_p7 = por %p2702_p0, %p2701_p12 }
  0xe4   : > { %p2704_p9 = pnand %p2703_p7, %p2697_p10 }
  0xe6   : > { %2707 = shalt.err (!%p2704_p9)
}
  0xe7   : > { %s2708_s10 = scalar_lea.vmem %s497_s1, 64  ;;  %s2848_s7 = smov [#allocation7]  }
  0xe8   : > { %p2709_p3 = scmp.ne.s32.totalorder %s497_s1, %s2708_s10  ;;  %s2713_s18 = sshll.u32 %s2848_s7, 4  ;;  %s2714_s18 = int_to_ptr.vmem [resolvable:$false] %s2713_s18 }
  0xe9   : > { %s2715_s29 = scalar_lea.vmem %s2714_s18, 128  ;;  %p2716_p8 = scmp.lt.s32.totalorder %s497_s1, %s2714_s18 }
  0xea   : > { %p2711_p11 = pnand %p2709_p3, %p3608_p1  ;;  %p2717_p5 = scmp.lt.s32.totalorder %s2715_s29, %s2708_s10 }
  0xec   : > { %p2712_p6 = pneg %p2711_p11  ;;  %p2718_p13 = por %p2717_p5, %p2716_p8 }
  0xee   : > { %p2719_p2 = pnand %p2718_p13, %p2712_p6 }
  0xf0   : > { %2722 = shalt.err (!%p2719_p2)
}
  0xf1   : > { %p3610_p4 = scmp.ne.s32.totalorder %s3600_s23, 0  ;;  %p3611_p10 = scmp.ne.s32.totalorder %s3588_s15, 0 }
  0xf2   : > { %s3235_s20 = sand.u32 (!%p3611_p10), 1, %s2829_s26   ;;  %p3612_p1 = scmp.ne.s32.totalorder (!%p3611_p10), %s3595_s19, 0 }
  0xf3   : > { %2398 = dma.hbm_to_vmem [thread:$0]  (!%p3610_p4), %s3188_s4, 64, %s497_s1, %s3087_s22  }
  0xf4   : > { %511 = sbr.rel (%p3611_p10) target bundleno = 1802 (0x70a), region = 68  ;;  %s3238_s12 = sshll.u32 (!%p3611_p10), %s3235_s20, 2 }
  0xf5   : > { %s514_s30 = scalar_lea.sflag (!%p3611_p10), [#allocation3], %s3235_s20  ;;  %s517_s13 = scalar_lea.vmem (!%p3611_p10), [#allocation2], %s3238_s12 }
  0xfb   : > { %2796 = dma.done.wait (%p3612_p1), %s514_s30, 64  }
  0xfc   : > { %2798 = vsyncadd (%p3612_p1), %s514_s30, 4294967232  ;;  %s522_s15 = sand.u32 1, %s2954_s14   ;;  %s526_s23 = scalar_lea.vmem [#allocation5], %s3238_s12 }
  0xfd   : > { %s523_s22 = scalar_lea.sflag [#allocation6], %s522_s15 }
  0xfe   : > { %2800 = dma.done.wait (%p3612_p1), %s523_s22, 128  }
  0xff   : > { %2802 = vsyncadd (%p3612_p1), %s523_s22, 4294967168  ;;  %s535_s4 = scalar_lea.vmem [#allocation7], %s3238_s12  ;;  %p3613_p13 = scmp.eq.s32.totalorder %s2954_s14, 0 }
 0x101   : > { %2804 = dma.done.wait (%p3613_p13), [#allocation9], 272   ;;  %p3614_p12 = pmov %p3613_p13 }
 0x103   : > { %2806 = vsyncadd (%p3614_p12), [#allocation9], 4294967024  ;;  %p3615_p0 = pmov %p3614_p12 }
 0x105   : > { %2808 = dma.done.wait (%p3615_p0), [#allocation12], 272   ;;  %p3616_p7 = pmov %p3615_p0 }
 0x106   : > { %p3617_p9 = pmov %p3615_p0 }
 0x107   : > { %2810 = vsyncadd (%p3616_p7), [#allocation12], 4294967024 }
 0x108   : > { %2812 = dma.done.wait (%p3617_p9), [#allocation15], 16   ;;  %p3618_p3 = pmov %p3615_p0 }
 0x109   : > { %v2849_v0 = vmov 0.0   ;;  %vm2850_vm0 = vmmov 0   ;;  %v2469_v1 = vld [vmem:[%s3545_s6] sm:$0xff]   ;;  %v2470_v2 = vld [vmem:[#allocation8] sm:$0xff]   ;;  %v2471_v3 = vld [vmem:[%s3545_s6 + $0x8] sm:$0xff]   ;;  %vm646_vm1 = vcmask 261120   ;;  %v837_v24 = vlaneseq }
 0x10a   : > { %2814 = vsyncadd (%p3618_p3), [#allocation15], 4294967280  ;;  %2271 = vmatprep.subr.bf16.mxu1 %v2849_v0  ;;  %2263 = vmatprep.subr.bf16.mxu0 %v2849_v0  ;;  %v621_v4 = vld [vmem:[%s526_s23] sm:$0xf]  ;;  %v2472_v5 = vld [vmem:[#allocation8 + $0x8] sm:$0xff]   ;;  %s2851_s16 = smov 104  }
 0x10b   : > { %2275 = vmatprep.mubr.msk.bf16.mxu1 %vm2850_vm0, %v2849_v0  ;;  %2267 = vmatprep.mubr.msk.bf16.mxu0 %vm2850_vm0, %v2849_v0  ;;  %v620_v6 = vld [vmem:[%s517_s13] sm:$0xf]  ;;  %v2199_v7 = vld [vmem:[#allocation11] ss:$0 sm:$0xff]  ;;  %v2195_v9 = vld [vmem:[#allocation10] ss:$0 sm:$0xff] }
 0x10c   : > { %2272 = vmatpush3.bf16.msra.mxu1 %v2469_v1  ;;  %2264 = vmatpush3.bf16.msra.mxu0 %v2470_v2  ;;  %v2473_v13 = vld [vmem:[#allocation13] sm:$0xff]   ;;  %s2852_s3 = smov 120   ;;  %v2474_v20 = vld [vmem:[#allocation13 + $0x8] sm:$0xff]   ;;  %s2853_s11 = smov 112   ;;  %v2854_v22 = vmov 1983009808  }
 0x10d   : > { %2273 = vmatprep.subr.bf16.mxu1 %v2849_v0  ;;  %2265 = vmatprep.subr.bf16.mxu0 %v2849_v0  ;;  %v622_v21 = vld [vmem:[%s535_s4] sm:$0xf]  ;;  %v835_v23 = vunpack.c.l.s4 %v2854_v22  ;;  %v2855_v25 = vmov 1934713408   ;;  %v3302_v28 = vshrl.u32 %v837_v24, 7  ;;  %vm1275_vm2 = vcmask 64512  }
 0x10e   : > { %v867_v26 = vunpack.c.l.s4 %v2855_v25  ;;  %p616_p11 = scmp.lt.s32.totalorder %s2954_s14, 1  ;;  %s3619_s10 = sld [smem:[#allocation33_spill]]  ;;  %vm1522_vm4 = vcmask 60416   ;;  %vm1530_vm5 = vcmask 1043456   ;;  %vm1861_vm6 = vcmask 130048  }
 0x10f   : > { %v836_v27 = vunpack.c.0.s8 %v835_v23  ;;  %s2194_s18 = sshll.u32 %s3235_s20, 4  ;;  %s3620_s13 = sld [smem:[#allocation36_spill]]  ;;  %vm1863_vm7 = vcmask 195584  }
 0x110   : > { %2274 = vmatpush3.bf16.msra.mxu1 %v2471_v3  ;;  %2266 = vmatpush3.bf16.msra.mxu0 %v2472_v5  ;;  %v868_v31 = vunpack.c.0.s8 %v867_v26  ;;  %s617_s21 = scalar_select %p616_p11, %s2954_s14, 1 }
 0x111   : > { %2287 = vmatprep.subr.bf16.mxu1 %v2849_v0  ;;  %2279 = vmatprep.subr.bf16.mxu0 %v2849_v0  ;;  %v3305_v32 = vsub.s32 %v836_v27, %v3302_v28  ;;  %s3397_s29 = scalar_lea.vmem [#allocation17], %s2194_s18  ;;  %s2856_s23 = smov 16  }
 0x112   : > { %v3308_v39 = vsub.s32 %v868_v31, %v3302_v28  ;;  %s2857_s4 = smov 8   ;;  %s2858_s19 = smov 24  }
 0x113   : > { %2276 = vmatmul.mubr.msk.bf16.vlgmr.msra.gmra.mrb[0].mxu1 %vm646_vm1, %v621_v4  ;;  %2268 = vmatmul.mubr.msk.bf16.vlgmr.msra.gmra.mrb[0].mxu0 %vm646_vm1, %v620_v6  ;;  %s3621_s17 = sld [smem:[#allocation30_spill]]  ;;  %s2234_s25 = sshll.u32 %s2954_s14, 8 }
 0x114   : > { %2289 = vmatprep.mubr.msk.bf16.mxu1 %vm2850_vm0, %v2849_v0  ;;  %2283 = vmatprep.mubr.msk.bf16.mxu0 %vm2850_vm0, %v2849_v0  ;;  %s618_s7 = scalar_lea.vmem %s3619_s10, %s617_s21  ;;  %s1965_s1 = sshll.u32 %s3397_s29, 4  ;;  %s3460_s1 = int_to_ptr.vmem [resolvable:$true] %s1965_s1 }
 0x115   : > { %2280 = vmatpush3.bf16.msra.mxu0 %v2473_v13  ;;  %s1939_s28 = scalar_lea.sflag [#allocation18], %s3235_s20  ;;  %s2723_s24 = scalar_lea.vmem %s3460_s1, 256 }
 0x116   : > { %2281 = vmatprep.subr.bf16.mxu0 %v2849_v0  ;;  %p2724_p6 = scmp.ne.s32.totalorder %s3460_s1, %s2723_s24  ;;  %s2859_s10 = smov [#allocation17]  }
 0x119   : > { %2282 = vmatpush3.bf16.msra.mxu0 %v2474_v20  ;;  %p3623_p8 = scmp.ne.s32.totalorder %s3621_s17, 0 }
 0x11a   : > { %2293 = vmatprep.subr.bf16.mxu0 %v2849_v0 }
 0x11b   : > { %p2725_p5 = pnand %p2724_p6, %p3623_p8 }
 0x11c   : > { %2284 = vmatmul.mubr.msk.bf16.vlgmr.msra.gmra.mrb[4].mxu0 %vm646_vm1, %v622_v21 }
 0x11d   : > { %2295 = vmatprep.mubr.msk.bf16.mxu0 %vm2850_vm0, %v2849_v0  ;;  %p2726_p2 = pneg %p2725_p5 }
 0x1e6   : > { %v750_v8 = vpop.f32.mrb[0].mxu1  ;;  %v684_v12 = vpop.f32.mrb[0].mxu0 }
 0x1e7   : > { %v751_v10 = vadd.f32 %v2199_v7, %v750_v8  ;;  %v2277_v11 = vpop.f32.mrb[1].mxu1  ;;  %v2269_v15 = vpop.f32.mrb[1].mxu0  ;;  %v685_v17 = vadd.f32 %v2195_v9, %v684_v12 }
 0x1e8   : > { %v753_v14 = vpop.f32.mrb[2].mxu1  ;;  %v687_v18 = vpop.f32.mrb[2].mxu0 }
 0x1e9   : > { %979 = vrot.lane.b32.xlu1 %v751_v10, %s2851_s16  ;;  %973 = vrot.lane.b32.xlu0 %v751_v10, %s2852_s3  ;;  %v2278_v16 = vpop.f32.mrb[3].mxu1  ;;  %v2270_v19 = vpop.f32.mrb[3].mxu0 }
 0x1ed   : > { %976 = vrot.lane.b32.xlu0 %v751_v10, %s2853_s11  ;;  %823 = vrot.lane.b32.xlu1 %v685_v17, %s2852_s3 }
 0x1f1   : > { %826 = vrot.lane.b32.xlu0 %v685_v17, %s2853_s11  ;;  %829 = vrot.lane.b32.xlu1 %v685_v17, %s2851_s16 }
 0x25b   : > { %v980_v29 = vpop.permute.xlu1 %979  ;;  %v974_v30 = vpop.permute.xlu0 %973 }
 0x25c   : > { %v998_v33 = vcombine.low %v974_v30, %v980_v29  ;;  %v999_v34 = vcombine.high %v974_v30, %v980_v29 }
 0x25e   : > { %v1006_v40 = vrot.slane %v998_v33, %v3305_v32  ;;  %v1013_v41 = vrot.slane %v999_v34, %v3305_v32 }
 0x25f   : > { %v977_v35 = vpop.permute.xlu0 %976  ;;  %v824_v36 = vpop.permute.xlu1 %823 }
 0x260   : > { %v982_v37 = vcombine.low %v751_v10, %v977_v35  ;;  %v983_v38 = vcombine.high %v751_v10, %v977_v35 }
 0x262   : > { %v990_v42 = vrot.slane %v982_v37, %v3305_v32  ;;  %v997_v43 = vrot.slane %v983_v38, %v3305_v32 }
 0x263   : > { %v827_v44 = vpop.permute.xlu0 %826  ;;  %v830_v45 = vpop.permute.xlu1 %829 }
 0x264   : > { %v1014_v46 = vcombine.low %v990_v42, %v1006_v40  ;;  %v1015_v47 = vcombine.high %v990_v42, %v1006_v40  ;;  %v1030_v48 = vcombine.low %v997_v43, %v1013_v41  ;;  %v1031_v49 = vcombine.high %v997_v43, %v1013_v41 }
 0x265   : > { %v832_v50 = vcombine.low %v685_v17, %v827_v44  ;;  %v833_v51 = vcombine.high %v685_v17, %v827_v44  ;;  %v848_v52 = vcombine.low %v824_v36, %v830_v45  ;;  %v849_v53 = vcombine.high %v824_v36, %v830_v45 }
 0x266   : > { %v1022_v54 = vrot.slane %v1014_v46, %v3308_v39  ;;  %v1029_v55 = vrot.slane %v1015_v47, %v3308_v39  ;;  %v1038_v56 = vrot.slane %v1030_v48, %v3308_v39  ;;  %v1045_v57 = vrot.slane %v1031_v49, %v3308_v39 }
 0x267   : > { %v840_v58 = vrot.slane %v832_v50, %v3305_v32  ;;  %v847_v59 = vrot.slane %v833_v51, %v3305_v32  ;;  %v856_v60 = vrot.slane %v848_v52, %v3305_v32  ;;  %v863_v61 = vrot.slane %v849_v53, %v3305_v32 }
 0x268   : > { %v1050_v62 = vcombine.low %v1022_v54, %v1029_v55  ;;  %v2209_v63 = vcombine.high %v1022_v54, %v1029_v55  ;;  %v1066_v1 = vcombine.low %v1038_v56, %v1045_v57  ;;  %v2210_v2 = vcombine.high %v1038_v56, %v1045_v57 }
 0x269   : > { %v864_v3 = vcombine.low %v840_v58, %v856_v60  ;;  %v865_v4 = vcombine.high %v840_v58, %v856_v60  ;;  %v880_v5 = vcombine.low %v847_v59, %v863_v61  ;;  %v881_v6 = vcombine.high %v847_v59, %v863_v61 }
 0x26a   : > { %v1057_v7 = vrot.slane %v1050_v62, %v3305_v32  ;;  %v1065_v8 = vrot.slane %v2209_v63, %v3305_v32  ;;  %v1073_v9 = vrot.slane %v1066_v1, %v3305_v32  ;;  %v1081_v10 = vrot.slane %v2210_v2, %v3305_v32  ;;  %v816_v62 = vpop.f32.mrb[4].mxu0 }
 0x26b   : > { %v872_v11 = vrot.slane %v864_v3, %v3308_v39  ;;  %v879_v12 = vrot.slane %v865_v4, %v3308_v39  ;;  %v888_v13 = vrot.slane %v880_v5, %v3308_v39  ;;  %v895_v14 = vrot.slane %v881_v6, %v3308_v39  ;;  %v2285_v63 = vpop.f32.mrb[5].mxu0  ;;  %v1272_v3 = vld [vmem:[%s618_s7] sm:$0x1]  ;;  %s2727_s7 = sshll.u32 %s2859_s10, 4  ;;  %s2728_s7 = int_to_ptr.vmem [resolvable:$false] %s2727_s7 }
 0x26c   : > { %v1082_v15 = vcombine.low %v1057_v7, %v1065_v8  ;;  %v1098_v16 = vcombine.low %v1073_v9, %v1081_v10  ;;  %v1083_v17 = vcombine.high %v1057_v7, %v1065_v8  ;;  %v1099_v18 = vcombine.high %v1073_v9, %v1081_v10  ;;  %v819_v1 = vpop.f32.mrb[6].mxu0  ;;  %s2729_s18 = scalar_lea.vmem %s2728_s7, 512  ;;  %p2730_p4 = scmp.lt.s32.totalorder %s3460_s1, %s2728_s7 }
 0x26d   : > { %v900_v19 = vcombine.low %v872_v11, %v879_v12  ;;  %v2207_v20 = vcombine.high %v872_v11, %v879_v12  ;;  %v916_v21 = vcombine.low %v888_v13, %v895_v14  ;;  %v2208_v22 = vcombine.high %v888_v13, %v895_v14  ;;  %v2286_v2 = vpop.f32.mrb[7].mxu0  ;;  %p2731_p10 = scmp.lt.s32.totalorder %s2729_s18, %s2723_s24 }
 0x26e   : > { %v1090_v23 = vrot.slane %v1082_v15, %v3308_v39  ;;  %v1106_v24 = vrot.slane %v1098_v16, %v3308_v39  ;;  %v1097_v33 = vrot.slane %v1083_v17, %v3308_v39  ;;  %v1113_v34 = vrot.slane %v1099_v18, %v3308_v39 }
 0x26f   : > { %v907_v25 = vrot.slane %v900_v19, %v3305_v32  ;;  %v915_v26 = vrot.slane %v2207_v20, %v3305_v32  ;;  %v923_v27 = vrot.slane %v916_v21, %v3305_v32  ;;  %v931_v29 = vrot.slane %v2208_v22, %v3305_v32  ;;  %p2732_p1 = por %p2731_p10, %p2730_p4 }
 0x270   : > { %v1114_v30 = vcombine.low %v1090_v23, %v1106_v24  ;;  %v1115_v31 = vcombine.high %v1090_v23, %v1106_v24  ;;  %v1116_v44 = vcombine.low %v1097_v33, %v1113_v34  ;;  %v1117_v45 = vcombine.high %v1097_v33, %v1113_v34 }
 0x271   : > { %v932_v35 = vcombine.low %v907_v25, %v915_v26  ;;  %v948_v36 = vcombine.low %v923_v27, %v931_v29  ;;  %v933_v46 = vcombine.high %v907_v25, %v915_v26  ;;  %v949_v47 = vcombine.high %v923_v27, %v931_v29  ;;  %p2733_p13 = pnand %p2732_p1, %p2726_p2 }
 0x272   : > { %v1118_v37 = vpack.c.bf16 %v1114_v30, %v1114_v30  ;;  %v1119_v38 = vpack.c.bf16 %v1115_v31, %v1115_v31  ;;  %v1120_v50 = vpack.c.bf16 %v1116_v44, %v1116_v44  ;;  %v1121_v51 = vpack.c.bf16 %v1117_v45, %v1117_v45 }
 0x273   : > { %v940_v40 = vrot.slane %v932_v35, %v3308_v39  ;;  %v956_v41 = vrot.slane %v948_v36, %v3308_v39  ;;  %v947_v54 = vrot.slane %v933_v46, %v3308_v39  ;;  %v963_v55 = vrot.slane %v949_v47, %v3308_v39  ;;  %v2203_v36 = vld [vmem:[#allocation14] ss:$0 sm:$0xff] }
 0x274   : > { %v1280_v42 = vsel %vm1275_vm2, %v1118_v37, 0  ;;  %v1326_v43 = vsel %vm1275_vm2, %v1119_v38, 0  ;;  %v1372_v56 = vsel %vm1275_vm2, %v1120_v50, 0  ;;  %v1418_v57 = vsel %vm1275_vm2, %v1121_v51, 0 }
 0x275   : > { %2288 = vmatpush3.bf16.xpose.msra.mxu1 %v1280_v42  ;;  %2294 = vmatpush3.bf16.xpose.msra.mxu0 %v1326_v43  ;;  %v964_v48 = vcombine.low %v940_v40, %v956_v41  ;;  %v965_v49 = vcombine.high %v940_v40, %v956_v41  ;;  %v966_v58 = vcombine.low %v947_v54, %v963_v55  ;;  %vm1273_vm3 = vcmp.eq.f32.partialorder %v1272_v3, 0.0 }
 0x276   : > { %2299 = vmatprep.subr.bf16.mxu1 %v2849_v0  ;;  %2305 = vmatprep.subr.bf16.mxu0 %v2849_v0  ;;  %v967_v59 = vcombine.high %v947_v54, %v963_v55  ;;  %v1467_v4 = vsub.s32 0, %v3302_v28  ;;  %v1274_v5 = vsel %vm1273_vm3, -1e+10, %v2849_v0  ;;  %v817_v37 = vadd.f32 %v2203_v36, %v816_v62 }
 0x277   : > { %v968_v52 = vpack.c.bf16 %v964_v48, %v964_v48  ;;  %v969_v53 = vpack.c.bf16 %v965_v49, %v965_v49  ;;  %v970_v60 = vpack.c.bf16 %v966_v58, %v966_v58 }
 0x278   : > { %v971_v61 = vpack.c.bf16 %v967_v59, %v967_v59  ;;  %v1468_v6 = vrot.slane %v1274_v5, %v1467_v4 }
 0x27c   : > { %2290 = vmatmul.mubr.msk.bf16.vlgmr.msra.gmra.mrb[4].mxu1 %vm1275_vm2, %v968_v52  ;;  %2296 = vmatmul.mubr.msk.bf16.vlgmr.msra.gmra.mrb[8].mxu0 %vm1275_vm2, %v969_v53 }
 0x27d   : > { %2300 = vmatpush3.bf16.xpose.msra.mxu1 %v1372_v56  ;;  %2306 = vmatpush3.bf16.xpose.msra.mxu0 %v1418_v57 }
 0x27e   : > { %2301 = vmatprep.mubr.msk.bf16.mxu1 %vm2850_vm0, %v2849_v0  ;;  %2307 = vmatprep.mubr.msk.bf16.mxu0 %vm2850_vm0, %v2849_v0 }
 0x27f   : > { %2311 = vmatprep.subr.bf16.mxu1 %v2849_v0  ;;  %2317 = vmatprep.subr.bf16.mxu0 %v2849_v0 }
 0x284   : > { %2302 = vmatmul.mubr.msk.bf16.vlgmr.msra.gmra.mrb[8].mxu1 %vm1275_vm2, %v970_v60  ;;  %2308 = vmatmul.mubr.msk.bf16.vlgmr.msra.gmra.mrb[12].mxu0 %vm1275_vm2, %v971_v61 }
 0x285   : > { %2313 = vmatprep.mubr.msk.bf16.mxu1 %vm2850_vm0, %v2849_v0  ;;  %2319 = vmatprep.mubr.msk.bf16.mxu0 %vm2850_vm0, %v2849_v0 }
 0x34f   : > { %v1316_v7 = vpop.f32.mrb[4].mxu1  ;;  %v1362_v8 = vpop.f32.mrb[8].mxu0 }
 0x350   : > { %v1460_v9 = vmul.f32 0.35355338, %v1316_v7  ;;  %v1461_v10 = vmul.f32 0.35355338, %v1362_v8  ;;  %v2291_v11 = vpop.f32.mrb[5].mxu1  ;;  %v2297_v12 = vpop.f32.mrb[9].mxu0 }
 0x351   : > { %v1319_v13 = vpop.f32.mrb[6].mxu1  ;;  %v1365_v14 = vpop.f32.mrb[10].mxu0 }
 0x352   : > { %v2292_v15 = vpop.f32.mrb[7].mxu1  ;;  %v2298_v16 = vpop.f32.mrb[11].mxu0  ;;  %v1470_v17 = vadd.f32 %v1468_v6, %v1460_v9  ;;  %v1471_v18 = vadd.f32 %v1468_v6, %v1461_v10 }
 0x354   : > { %v1474_v19 = vsel %vm1275_vm2, %v1470_v17, -inf  ;;  %v1477_v20 = vsel %vm1275_vm2, %v1471_v18, -inf }
 0x355   : > { %1475 = vmax.xlane.f32.xlu0 %v1474_v19  ;;  %1478 = vmax.xlane.f32.xlu1 %v1477_v20 }
 0x357   : > { %v1408_v28 = vpop.f32.mrb[8].mxu1  ;;  %v1454_v21 = vpop.f32.mrb[12].mxu0 }
 0x358   : > { %v1462_v22 = vmul.f32 0.35355338, %v1408_v28  ;;  %v1463_v23 = vmul.f32 0.35355338, %v1454_v21  ;;  %v2303_v24 = vpop.f32.mrb[9].mxu1  ;;  %v2309_v25 = vpop.f32.mrb[13].mxu0 }
 0x359   : > { %v1411_v26 = vpop.f32.mrb[10].mxu1  ;;  %v1457_v27 = vpop.f32.mrb[14].mxu0 }
 0x35a   : > { %v2304_v29 = vpop.f32.mrb[11].mxu1  ;;  %v2310_v30 = vpop.f32.mrb[15].mxu0  ;;  %v1472_v31 = vadd.f32 %v1468_v6, %v1462_v22  ;;  %v1473_v34 = vadd.f32 %v1468_v6, %v1463_v23 }
 0x35c   : > { %v1480_v33 = vsel %vm1275_vm2, %v1472_v31, -inf  ;;  %v1483_v35 = vsel %vm1275_vm2, %v1473_v34, -inf }
 0x35d   : > { %1481 = vmax.xlane.f32.xlu0 %v1480_v33 }
 0x361   : > { %1484 = vmax.xlane.f32.xlu0 %v1483_v35 }
 0x366   : > { %1123 = vrot.lane.b32.xlu1 %v817_v37, %s2852_s3 }
 0x3e2   : > { %v1476_v38 = vpop.xlane.xlu0 %1475  ;;  %v1479_v40 = vpop.xlane.xlu1 %1478 }
 0x3e3   : > { %v1486_v41 = vsub.f32 %v1470_v17, %v1476_v38  ;;  %v1487_v42 = vsub.f32 %v1471_v18, %v1479_v40 }
 0x3e5   : > { %v1490_v43 = vmul.f32 1.442695, %v1486_v41  ;;  %v1492_v44 = vmul.f32 1.442695, %v1487_v42 }
 0x3e6   : > { %v1124_v59 = vpop.permute.xlu1 %1123 }
 0x3e7   : > { %2477 = vpow2.f32 %v1490_v43 }
 0x3e8   : > { %2479 = vpow2.f32 %v1492_v44 }
 0x3ea   : > { %v1482_v49 = vpop.xlane.xlu0 %1481 }
 0x3eb   : > { %v1488_v51 = vsub.f32 %v1472_v31, %v1482_v49 }
 0x3ed   : > { %v1494_v53 = vmul.f32 1.442695, %v1488_v51 }
 0x3ee   : > { %v1485_v50 = vpop.xlane.xlu0 %1484 }
 0x3ef   : > { %v1489_v52 = vsub.f32 %v1473_v34, %v1485_v50  ;;  %2481 = vpow2.f32 %v1494_v53 }
 0x3f1   : > { %v2478_v45 = vpop.eup %2477  ;;  %v1496_v54 = vmul.f32 1.442695, %v1489_v52 }
 0x3f2   : > { %v2480_v46 = vpop.eup %2479  ;;  %v1498_v47 = vsel %vm1275_vm2, %v2478_v45, 0.0 }
 0x3f3   : > { %1499 = vadd.xlane.f32.xlu1 %v1498_v47  ;;  %v1501_v48 = vsel %vm1275_vm2, %v2480_v46, 0.0  ;;  %2483 = vpow2.f32 %v1496_v54 }
 0x3f4   : > { %1502 = vadd.xlane.f32.xlu0 %v1501_v48 }
 0x3f9   : > { %v3378_v55 = vpop.eup %2481 }
 0x3fa   : > { %v1504_v57 = vsel %vm1275_vm2, %v3378_v55, 0.0 }
 0x3fd   : > { %v3380_v56 = vpop.eup %2483 }
 0x3fe   : > { %v1507_v58 = vsel %vm1275_vm2, %v3380_v56, 0.0 }
 0x404   : > { %1129 = vrot.lane.b32.xlu1 %v817_v37, %s2851_s16 }
 0x40a   : > { %1126 = vrot.lane.b32.xlu0 %v817_v37, %s2853_s11  ;;  %s3622_s11 = sld [smem:[#allocation39_spill]] }
 0x410   : > { %s3458_s21 = scalar_lea.hbm %s3622_s11, %s2234_s25 }
 0x428   : > { %1505 = vadd.xlane.f32.xlu1 %v1504_v57 }
 0x429   : > { %1508 = vadd.xlane.f32.xlu0 %v1507_v58 }
 0x480   : > { %v1500_v60 = vpop.xlane.xlu1 %1499 }
 0x481   : > { %2485 = vrcp.f32 %v1500_v60  ;;  %v1503_v61 = vpop.xlane.xlu0 %1502 }
 0x482   : > { %2487 = vrcp.f32 %v1503_v61 }
 0x484   : > { %v1130_v62 = vpop.permute.xlu1 %1129 }
 0x485   : > { %v1148_v63 = vcombine.low %v1124_v59, %v1130_v62  ;;  %v1149_v1 = vcombine.high %v1124_v59, %v1130_v62  ;;  %v1127_v2 = vpop.permute.xlu0 %1126 }
 0x486   : > { %v1132_v3 = vcombine.low %v817_v37, %v1127_v2  ;;  %v1133_v4 = vcombine.high %v817_v37, %v1127_v2 }
 0x487   : > { %v1156_v5 = vrot.slane %v1148_v63, %v3305_v32  ;;  %v1163_v6 = vrot.slane %v1149_v1, %v3305_v32 }
 0x488   : > { %v1140_v7 = vrot.slane %v1132_v3, %v3305_v32  ;;  %v1147_v8 = vrot.slane %v1133_v4, %v3305_v32 }
 0x48a   : > { %v1164_v9 = vcombine.low %v1140_v7, %v1156_v5  ;;  %v1165_v10 = vcombine.high %v1140_v7, %v1156_v5  ;;  %v1180_v11 = vcombine.low %v1147_v8, %v1163_v6  ;;  %v1181_v12 = vcombine.high %v1147_v8, %v1163_v6 }
 0x48b   : > { %v2486_v13 = vpop.eup %2485 }
 0x48c   : > { %v2488_v14 = vpop.eup %2487  ;;  %v1514_v15 = vmul.f32 %v2486_v13, %v2478_v45  ;;  %v1172_v16 = vrot.slane %v1164_v9, %v3308_v39  ;;  %v1179_v17 = vrot.slane %v1165_v10, %v3308_v39  ;;  %v1188_v18 = vrot.slane %v1180_v11, %v3308_v39 }
 0x48d   : > { %v1515_v19 = vmul.f32 %v2488_v14, %v2480_v46  ;;  %v1195_v20 = vrot.slane %v1181_v12, %v3308_v39 }
 0x48e   : > { %v1200_v28 = vcombine.low %v1172_v16, %v1179_v17  ;;  %v2211_v21 = vcombine.high %v1172_v16, %v1179_v17  ;;  %v1518_v22 = vpack.c.bf16 %v1514_v15, %v1514_v15 }
 0x48f   : > { %v1216_v23 = vcombine.low %v1188_v18, %v1195_v20  ;;  %v2212_v24 = vcombine.high %v1188_v18, %v1195_v20  ;;  %v1519_v25 = vpack.c.bf16 %v1515_v19, %v1515_v19 }
 0x490   : > { %v1207_v26 = vrot.slane %v1200_v28, %v3305_v32  ;;  %v1215_v27 = vrot.slane %v2211_v21, %v3305_v32  ;;  %1523 = vst.msk [vmem:[%s3397_s29] sm:$0xf] %vm1522_vm4, %v1518_v22 }
 0x491   : > { %v1223_v29 = vrot.slane %v1216_v23, %v3305_v32  ;;  %v1231_v30 = vrot.slane %v2212_v24, %v3305_v32  ;;  %1524 = vst.msk [vmem:[%s3397_s29 + $0x4] sm:$0xf] %vm1522_vm4, %v1519_v25 }
 0x492   : > { %v1232_v31 = vcombine.low %v1207_v26, %v1215_v27  ;;  %v1233_v33 = vcombine.high %v1207_v26, %v1215_v27 }
 0x493   : > { %v1248_v34 = vcombine.low %v1223_v29, %v1231_v30  ;;  %v1249_v35 = vcombine.high %v1223_v29, %v1231_v30 }
 0x494   : > { %v1240_v36 = vrot.slane %v1232_v31, %v3308_v39  ;;  %v1247_v37 = vrot.slane %v1233_v33, %v3308_v39 }
 0x495   : > { %v1256_v38 = vrot.slane %v1248_v34, %v3308_v39  ;;  %v1263_v40 = vrot.slane %v1249_v35, %v3308_v39 }
 0x497   : > { %v1264_v41 = vcombine.low %v1240_v36, %v1256_v38  ;;  %v1265_v42 = vcombine.high %v1240_v36, %v1256_v38  ;;  %v1266_v43 = vcombine.low %v1247_v37, %v1263_v40  ;;  %v1267_v44 = vcombine.high %v1247_v37, %v1263_v40  ;;  %v2476_v36 = vld [vmem:[%s3620_s13 + $0x8] sm:$0xff]  }
 0x499   : > { %v1268_v45 = vpack.c.bf16 %v1264_v41, %v1264_v41  ;;  %v1269_v46 = vpack.c.bf16 %v1265_v42, %v1265_v42  ;;  %v1270_v49 = vpack.c.bf16 %v1266_v43, %v1266_v43  ;;  %v1271_v50 = vpack.c.bf16 %v1267_v44, %v1267_v44 }
 0x49b   : > { %v1532_v47 = vsel %vm1530_vm5, %v1268_v45, 0  ;;  %v1578_v48 = vsel %vm1530_vm5, %v1269_v46, 0  ;;  %v1624_v51 = vsel %vm1530_vm5, %v1270_v49, 0  ;;  %v1670_v52 = vsel %vm1530_vm5, %v1271_v50, 0 }
 0x49c   : > { %2312 = vmatpush3.bf16.msra.mxu1 %v1532_v47  ;;  %2318 = vmatpush3.bf16.msra.mxu0 %v1578_v48 }
 0x49d   : > { %2323 = vmatprep.subr.bf16.mxu1 %v2849_v0  ;;  %2329 = vmatprep.subr.bf16.mxu0 %v2849_v0 }
 0x49f   : > { %2314 = vmatmul.mubr.msk.bf16.vlgmr.msra.gmra.mrb[12].mxu1 %vm1275_vm2, %v1518_v22  ;;  %2320 = vmatmul.mubr.msk.bf16.vlgmr.msra.gmra.mrb[16].mxu0 %vm1275_vm2, %v1519_v25  ;;  %v2475_v25 = vld [vmem:[%s3620_s13] sm:$0xff]  }
 0x4a0   : > { %2324 = vmatpush3.bf16.msra.mxu1 %v1624_v51  ;;  %2330 = vmatpush3.bf16.msra.mxu0 %v1670_v52 }
 0x4a1   : > { %2325 = vmatprep.mubr.msk.bf16.mxu1 %vm2850_vm0, %v2849_v0  ;;  %2331 = vmatprep.mubr.msk.bf16.mxu0 %vm2850_vm0, %v2849_v0 }
 0x4a2   : > { %2335 = vmatprep.subr.bf16.mxu1 %v2849_v0 }
 0x4b5   : > { %v1506_v53 = vpop.xlane.xlu1 %1505 }
 0x4b6   : > { %2489 = vrcp.f32 %v1506_v53  ;;  %v1509_v54 = vpop.xlane.xlu0 %1508 }
 0x4b7   : > { %2491 = vrcp.f32 %v1509_v54 }
 0x4c0   : > { %v2490_v57 = vpop.eup %2489 }
 0x4c1   : > { %v2492_v58 = vpop.eup %2491  ;;  %v1516_v59 = vmul.f32 %v2490_v57, %v3378_v55 }
 0x4c2   : > { %v1517_v60 = vmul.f32 %v2492_v58, %v3380_v56 }
 0x4c3   : > { %v1520_v61 = vpack.c.bf16 %v1516_v59, %v1516_v59 }
 0x4c4   : > { %v1521_v62 = vpack.c.bf16 %v1517_v60, %v1517_v60 }
 0x4c5   : > { %1525 = vst.msk [vmem:[%s3397_s29 + $0x8] sm:$0xf] %vm1522_vm4, %v1520_v61  ;;  %2326 = vmatmul.mubr.msk.bf16.vlgmr.msra.gmra.mrb[16].mxu1 %vm1275_vm2, %v1520_v61 }
 0x4c6   : > { %1526 = vst.msk [vmem:[%s3397_s29 + $0xc] sm:$0xf] %vm1522_vm4, %v1521_v62  ;;  %2332 = vmatmul.mubr.msk.bf16.vlgmr.msra.gmra.mrb[20].mxu0 %vm1275_vm2, %v1521_v62  ;;  %2339 = vmatprep.mubr.msk.bf16.mxu1 %vm2850_vm0, %v2849_v0 }
 0x4c7   : > { %2336 = vmatpush3.bf16.msra.mxu1 %v2475_v25 }
 0x4c8   : > { %2337 = vmatprep.subr.bf16.mxu1 %v2849_v0 }
 0x4cb   : > { %2338 = vmatpush3.bf16.msra.mxu1 %v2476_v36 }
 0x572   : > { %v1568_v63 = vpop.f32.mrb[12].mxu1  ;;  %v1614_v1 = vpop.f32.mrb[16].mxu0 }
 0x573   : > { %v2315_v2 = vpop.f32.mrb[13].mxu1  ;;  %v2321_v3 = vpop.f32.mrb[17].mxu0 }
 0x574   : > { %v1571_v55 = vpop.f32.mrb[14].mxu1  ;;  %v1617_v4 = vpop.f32.mrb[18].mxu0 }
 0x575   : > { %v2316_v56 = vpop.f32.mrb[15].mxu1  ;;  %v2322_v5 = vpop.f32.mrb[19].mxu0 }
 0x598   : > { %v1660_v6 = vpop.f32.mrb[16].mxu1 }
 0x599   : > { %v1712_v7 = vcombine.low %v1568_v63, %v1660_v6  ;;  %v1713_v8 = vcombine.high %v1568_v63, %v1660_v6  ;;  %v1706_v9 = vpop.f32.mrb[20].mxu0  ;;  %v2327_v10 = vpop.f32.mrb[17].mxu1 }
 0x59a   : > { %v1728_v11 = vcombine.low %v1614_v1, %v1706_v9  ;;  %v1729_v12 = vcombine.high %v1614_v1, %v1706_v9  ;;  %v2333_v13 = vpop.f32.mrb[21].mxu0  ;;  %v1663_v14 = vpop.f32.mrb[18].mxu1 }
 0x59b   : > { %v1720_v15 = vrot.slane %v1712_v7, %v3305_v32  ;;  %v1727_v16 = vrot.slane %v1713_v8, %v3305_v32  ;;  %v1709_v17 = vpop.f32.mrb[22].mxu0  ;;  %v2328_v18 = vpop.f32.mrb[19].mxu1 }
 0x59c   : > { %v1736_v19 = vrot.slane %v1728_v11, %v3305_v32  ;;  %v1743_v20 = vrot.slane %v1729_v12, %v3305_v32  ;;  %v2334_v28 = vpop.f32.mrb[23].mxu0 }
 0x59e   : > { %v1744_v21 = vcombine.low %v1720_v15, %v1736_v19  ;;  %v1745_v22 = vcombine.high %v1720_v15, %v1736_v19  ;;  %v1760_v23 = vcombine.low %v1727_v16, %v1743_v20  ;;  %v1761_v24 = vcombine.high %v1727_v16, %v1743_v20 }
 0x5a0   : > { %v1752_v26 = vrot.slane %v1744_v21, %v3308_v39  ;;  %v1759_v27 = vrot.slane %v1745_v22, %v3308_v39  ;;  %v1768_v29 = vrot.slane %v1760_v23, %v3308_v39  ;;  %v1775_v30 = vrot.slane %v1761_v24, %v3308_v39 }
 0x5a2   : > { %v1780_v31 = vcombine.low %v1752_v26, %v1759_v27  ;;  %v2221_v33 = vcombine.high %v1752_v26, %v1759_v27  ;;  %v1796_v34 = vcombine.low %v1768_v29, %v1775_v30  ;;  %v2222_v35 = vcombine.high %v1768_v29, %v1775_v30 }
 0x5a4   : > { %v1787_v37 = vrot.slane %v1780_v31, %v3305_v32  ;;  %v1795_v38 = vrot.slane %v2221_v33, %v3305_v32  ;;  %v1803_v40 = vrot.slane %v1796_v34, %v3305_v32  ;;  %v1811_v41 = vrot.slane %v2222_v35, %v3305_v32 }
 0x5a6   : > { %v1813_v42 = vcombine.high %v1787_v37, %v1795_v38  ;;  %v1829_v43 = vcombine.high %v1803_v40, %v1811_v41  ;;  %v1812_v0 = vcombine.low %v1787_v37, %v1795_v38  ;;  %v1828_v44 = vcombine.low %v1803_v40, %v1811_v41 }
 0x5a8   : > { %v1827_v45 = vrot.slane %v1813_v42, %v3308_v39  ;;  %v1843_v46 = vrot.slane %v1829_v43, %v3308_v39  ;;  %v1820_v47 = vrot.slane %v1812_v0, %v3308_v39  ;;  %v1836_v48 = vrot.slane %v1828_v44, %v3308_v39 }
 0x5aa   : > { %v1846_v49 = vcombine.low %v1827_v45, %v1843_v46  ;;  %v1845_v50 = vcombine.high %v1820_v47, %v1836_v48  ;;  %v1847_v51 = vcombine.high %v1827_v45, %v1843_v46  ;;  %v1844_v52 = vcombine.low %v1820_v47, %v1836_v48 }
 0x5ac   : > { %1853 = vrot.lane.b32.xlu1 %v1846_v49, %s2856_s23  ;;  %1849 = vrot.lane.b32.xlu0 %v1845_v50, %s2857_s4 }
 0x5b0   : > { %1857 = vrot.lane.b32.xlu1 %v1847_v51, %s2858_s19 }
 0x61e   : > { %v1854_v32 = vpop.permute.xlu1 %1853  ;;  %v1850_v53 = vpop.permute.xlu0 %1849 }
 0x61f   : > { %v1860_v54 = vsel %vm1275_vm2, %v1844_v52, %v1850_v53 }
 0x620   : > { %v1862_v57 = vsel %vm1861_vm6, %v1860_v54, %v1854_v32 }
 0x622   : > { %v1858_v39 = vpop.permute.xlu1 %1857 }
 0x623   : > { %v1864_v58 = vsel %vm1863_vm7, %v1862_v57, %v1858_v39 }
 0x624   : > { %v1865_v59 = vpack.c.bf16 %v1864_v58, %v1864_v58 }
 0x626   : > { %2340 = vmatmul.mubr.msk.bf16.vlgmr.msra.gmra.mrb[20].mxu1 %vm646_vm1, %v1865_v59 }
 0x627   : > { %2736 = shalt.err (!%p2733_p13)
}
 0x628   : > { %s2737_s29 = scalar_lea.hbm %s3458_s21, 256  ;;  %s2741_s15 = scalar_lea.hbm %s3622_s11, 512 }
 0x629   : > { %p2738_p12 = scmp.ne.s32.totalorder %s3458_s21, %s2737_s29  ;;  %p2742_p9 = scmp.lt.u32.totalorder %s3458_s21, %s3622_s11 }
 0x62a   : > { %p2743_p3 = scmp.lt.u32.totalorder %s2741_s15, %s2737_s29  ;;  %p2745_p6 = scmp.lt.u32.totalorder %s2737_s29, %s3458_s21 }
 0x62b   : > { %p2739_p0 = pnand %p2738_p12, %p3623_p8 }
 0x62c   : > { %p2744_p11 = por %p2743_p3, %p2742_p9 }
 0x62d   : > { %p2740_p7 = pneg %p2739_p0 }
 0x62e   : > { %p2746_p5 = por %p2745_p6, %p2744_p11 }
 0x630   : > { %p2747_p2 = pnand %p2746_p5, %p2740_p7 }
 0x632   : > { %2750 = shalt.err (!%p2747_p2)
}
 0x633   : > { %s2860_s4 = smov 64   ;;  %s2861_s19 = smov 4  }
 0x634   : > { %2370 = dma.vmem_to_hbm [thread:$0]  (%p3623_p8), %s3460_s1, 256, %s3458_s21, %s1939_s28, %s2860_s4, %s2860_s4, %s2861_s19  }
 0x635   : > { %s2193_s25 = sshll.u32 %s3235_s20, 3  ;;  %s3624_s24 = sld [smem:[#allocation37_spill]] }
 0x636   : > { %s2229_s10 = sshll.u32 %s2954_s14, 7  ;;  %s608_s7 = scalar_lea.vmem [#allocation16], %s2193_s25 }
 0x637   : > { %s1952_s18 = sshll.u32 %s608_s7, 4  ;;  %s3625_s30 = sld [smem:[#allocation38_spill]]  ;;  %s3496_s18 = int_to_ptr.vmem [resolvable:$true] %s1952_s18 }
 0x638   : > { %s1934_s14 = scalar_lea.sflag [#allocation4], %s3235_s20  ;;  %s2751_s1 = scalar_lea.vmem %s3496_s18, 128 }
 0x639   : > { %p2752_p4 = scmp.ne.s32.totalorder %s3496_s18, %s2751_s1  ;;  %s2862_s21 = smov [#allocation16]  }
 0x63a   : > { %s2755_s28 = sshll.u32 %s2862_s21, 4  ;;  %s2756_s28 = int_to_ptr.vmem [resolvable:$false] %s2755_s28 }
 0x63b   : > { %v2223_v60 = vld [vmem:[%s3624_s24] ss:$0 sm:$0xff]  ;;  %p2753_p10 = pnand %p2752_p4, %p3623_p8  ;;  %s2757_s22 = scalar_lea.vmem %s2756_s28, 256 }
 0x63c   : > { %p2758_p13 = scmp.lt.s32.totalorder %s3496_s18, %s2756_s28  ;;  %p2759_p12 = scmp.lt.s32.totalorder %s2757_s22, %s2751_s1 }
 0x63d   : > { %s3494_s15 = scalar_lea.hbm %s3625_s30, %s2229_s10  ;;  %p2754_p1 = pneg %p2753_p10 }
 0x63e   : > { %p2760_p0 = por %p2759_p12, %p2758_p13 }
 0x640   : > { %p2761_p7 = pnand %p2760_p0, %p2754_p1 }
 0x6f9   : > { %v1926_v61 = vpop.f32.mrb[20].mxu1 }
 0x6fa   : > { %v1927_v62 = vadd.f32 %v2223_v60, %v1926_v61  ;;  %v2341_v63 = vpop.f32.mrb[21].mxu1 }
 0x6fb   : > { %v1929_v1 = vpop.f32.mrb[22].mxu1 }
 0x6fc   : > { %v2342_v2 = vpop.f32.mrb[23].mxu1  ;;  %1932 = vst.msk [vmem:[%s608_s7] sm:$0xff] %vm646_vm1, %v1927_v62 }
 0x6fd   : > { %2764 = shalt.err (!%p2761_p7)
}
 0x6fe   : > { %s2765_s20 = scalar_lea.hbm %s3494_s15, 128  ;;  %s2769_s19 = scalar_lea.hbm %s3625_s30, 256 }
 0x6ff   : > { %p2766_p9 = scmp.ne.s32.totalorder %s3494_s15, %s2765_s20  ;;  %p2770_p6 = scmp.lt.u32.totalorder %s3494_s15, %s3625_s30 }
 0x700   : > { %p2771_p5 = scmp.lt.u32.totalorder %s2769_s19, %s2765_s20  ;;  %p2773_p4 = scmp.lt.u32.totalorder %s2765_s20, %s3494_s15 }
 0x701   : > { %p2767_p3 = pnand %p2766_p9, %p3623_p8 }
 0x702   : > { %p2772_p2 = por %p2771_p5, %p2770_p6 }
 0x703   : > { %p2768_p11 = pneg %p2767_p3 }
 0x704   : > { %p2774_p10 = por %p2773_p4, %p2772_p2 }
 0x706   : > { %p2775_p1 = pnand %p2774_p10, %p2768_p11 }
 0x708   : > { %2778 = shalt.err (!%p2775_p1)
}
 0x709   : > { %2369 = dma.vmem_to_hbm [thread:$0]  (%p3623_p8), %s3496_s18, 128, %s3494_s15, %s1934_s14  }
 0x70a PF: > { %s3626_s3 = sld [smem:[#allocation26_spill]]  ;;  %s3627_s24 = sld [smem:[#allocation31_spill]] }
 0x70b   : > { %s3628_s10 = sld [smem:[#allocation27_spill]] }
 0x710   : > { %s1980_s7 = sand.u32 1, %s3626_s3   ;;  %p3629_p13 = scmp.ne.s32.totalorder %s3627_s24, 0 }
 0x711   : > { %p3630_p12 = scmp.ge.s32.totalorder %s3628_s10, 2  ;;  %s1981_s29 = scalar_lea.sflag [#allocation4], %s1980_s7 }
 0x713   : > { %p2400_p0 = pnand %p3630_p12, %p3629_p13 }
 0x715   : > { %2816 = dma.done.wait (!%p2400_p0), %s1981_s29, 128  }
 0x716   : > { %2818 = vsyncadd (!%p2400_p0), %s1981_s29, 4294967168  ;;  %s1990_s12 = scalar_lea.sflag [#allocation18], %s1980_s7 }
 0x717   : > { %2820 = dma.done.wait (!%p2400_p0), %s1990_s12, 256  }
 0x718   : > { %2822 = vsyncadd (!%p2400_p0), %s1990_s12, 4294967040  ;;  %s3631_s28 = sld [smem:[#allocation28_spill]]  ;;  %s3632_s17 = sld [smem:[#allocation29_spill]] }
 0x719   : > { %s3633_s25 = smov %s2829_s26  ;;  %s3634_s26 = smov %s2833_s27 }
 0x71e   : > { %p36_p8 = scmp.ge.s32.totalorder %s3631_s28, 4   ;;  %s3635_s27 = smov %s3632_s17 }
 0x720   :  { %38 = sbr.rel (!%p36_p8) target bundleno = 21 (0x15), region = 177 }
 0x727   :  { %1995 = vsyncpa [#allocation3], 1 }
 0x728   :  { %1997 = vsyncpa [#allocation3 + $0x1], 1 }
 0x729   :  { %1998 = vsyncpa [#allocation6], 1 }
 0x72a   :  { %2000 = vsyncpa [#allocation6 + $0x1], 1 }
 0x72b   :  { %2001 = vsyncpa [#allocation9], 1 }
 0x72c   :  { %2002 = vsyncpa [#allocation12], 1 }
 0x72d   :  { %2003 = vsyncpa [#allocation15], 1 }
 0x72e   :  { %2004 = vsyncpa [#allocation4], 1 }
 0x72f   :  { %2006 = vsyncpa [#allocation4 + $0x1], 1 }
 0x730   :  { %2007 = vsyncpa [#allocation18], 1 }
 0x731   :  { %2009 = vsyncpa [#allocation18 + $0x1], 1 }

</bundles_post_ra>
